<compile_context>
chip_gen: v5e
topology: v5e:2x2
jax: 0.10.0
libtpu: 0.0.40
codegen_flags: <defaults>
</compile_context>

<pallas_src>
import functools
import math

import jax
import jax.numpy as jnp
from jax.experimental import pallas as pl
from jax.experimental.pallas import tpu as pltpu

# ------------------------- small synthetic config --------------------------
B = 2
C = 3
IMG = 16
PATCH = 8
N_PATCH = (IMG // PATCH) ** 2          # 4 patch tokens
D = 32                                 # vision hidden (stands in for 1152)
N_HEADS = 2
HEAD_DIM = D // N_HEADS
MLP_DIM = 64
N_VIS_LAYERS = 2

VOCAB = 100
S_TXT = 8                              # stands in for MAX_TEXT_LEN = 128
D_TXT = 32                             # text hidden (stands in for 768)
N_TXT_LAYERS = 1
LATENT = 32                            # stands in for latent_dim = 1152
N_CLASSES = 2
CLS_PAD = 128                          # lane-dense slab width for cls head

VMEM = pltpu.MemorySpace.VMEM
SMEM = pltpu.MemorySpace.SMEM
VMEM_LIMIT = 32 << 20                  # explicit scoped-VMEM budget (all gens)


# ----------------------------- kernel helpers -------------------------------
def _ln2d(x, g, b, eps=1e-6):
    """LayerNorm over last axis of a 2-D f32 value; g/b are (1, D).
    eps=1e-6 matches SigLIP's layer_norm_eps."""
    mu = jnp.mean(x, axis=-1, keepdims=True)
    var = jnp.mean((x - mu) ** 2, axis=-1, keepdims=True)
    return (x - mu) * jax.lax.rsqrt(var + eps) * g + b


def _const_spec(arr):
    """Full-array block with a constant index_map (fetched once, resident)."""
    nd = arr.ndim
    return pl.BlockSpec(arr.shape, lambda i, nd=nd: (0,) * nd)


# ------------------------------- kernels -----------------------------------
def _patch_embed_kernel(p_ref, w_ref, b_ref, pos_ref, o_ref):
    """One batch element: patches (N, C*P*P) @ W + bias + pos -> bf16."""
    _, n, cpp = p_ref.shape
    x = jnp.dot(p_ref[...].reshape(n, cpp).astype(jnp.bfloat16), w_ref[...],
                preferred_element_type=jnp.float32) + b_ref[...]
    x = x + pos_ref[...].reshape(n, -1)
    o_ref[...] = x.reshape(1, n, -1).astype(o_ref.dtype)


def _fused_layer_kernel(x_ref, *refs, n_heads, head_dim, has_mask):
    """One full pre-LN transformer encoder layer for one batch element."""
    if has_mask:
        attn_bias_ref = refs[0]
        refs = refs[1:]
    (ln1_g, ln1_b, wqkv, bqkv, wo, bo,
     ln2_g, ln2_b, w1, b1, w2, b2, o_ref) = refs

    _, seq, d = x_ref.shape
    x = x_ref[...].reshape(seq, d).astype(jnp.float32)   # bf16 residual -> f32

    # ---- attention block ----
    h = _ln2d(x, ln1_g[...], ln1_b[...])
    qkv = jnp.dot(h.astype(jnp.bfloat16), wqkv[...],
                  preferred_element_type=jnp.float32) + bqkv[...]
    # q is already scaled by 1/sqrt(head_dim): folded into wq/bq at pack time.

    if has_mask:
        # hoisted once: JAX does not CSE broadcast_in_dim across the head loop
        bias = jnp.broadcast_to(attn_bias_ref[...].reshape(1, seq), (seq, seq))

    wo_all = wo[...]
    attn = jnp.zeros((seq, d), jnp.float32)
    # TODO(synk): at real SigLIP sizes (16 heads, S=729) replace this static
    # unroll with a flash-style KV-tiled loop (online softmax + f32 scratch).
    for hh in range(n_heads):
        sl = slice(hh * head_dim, (hh + 1) * head_dim)
        q = qkv[:, sl].astype(jnp.bfloat16)
        k = qkv[:, d + hh * head_dim:d + (hh + 1) * head_dim].astype(jnp.bfloat16)
        v = qkv[:, 2 * d + hh * head_dim:
                2 * d + (hh + 1) * head_dim].astype(jnp.bfloat16)
        s = jax.lax.dot_general(q, k, (((1,), (1,)), ((), ())),
                                preferred_element_type=jnp.float32)
        if has_mask:
            s = s + bias
        s = s - jnp.max(s, axis=-1, keepdims=True)
        p = jnp.exp(s)
        p = p * pl.reciprocal(jnp.sum(p, axis=-1, keepdims=True), approx=True)
        hov = jnp.dot(p.astype(jnp.bfloat16), v,
                      preferred_element_type=jnp.float32)
        # accumulate straight into the out-projection slice: no lane concat.
        attn = attn + jnp.dot(hov.astype(jnp.bfloat16), wo_all[sl, :],
                              preferred_element_type=jnp.float32)
    x = x + attn + bo[...]                                # residual 1 (f32)

    # ---- MLP block ----
    # TODO(synk): at real sizes tile the 4304-wide hidden (N-of-w1 / K-of-w2
    # loop with an f32 accumulator) so the GELU intermediate never fully
    # materializes.
    h = _ln2d(x, ln2_g[...], ln2_b[...])
    h = jnp.dot(h.astype(jnp.bfloat16), w1[...],
                preferred_element_type=jnp.float32) + b1[...]
    # SigLIP uses gelu_pytorch_tanh, so the tanh approximation matches.
    h = jax.nn.gelu(h, approximate=True)
    h = jnp.dot(h.astype(jnp.bfloat16), w2[...],
                preferred_element_type=jnp.float32) + b2[...]
    o_ref[...] = (x + h).reshape(1, seq, d).astype(o_ref.dtype)   # residual 2


def _head_loss_kernel(vis_ref, txt_ref, mask_ref,
                      post_g, post_b, fin_g, fin_b,
                      w_cls, b_cls, w_ip, b_ip, w_tp, b_tp,
                      t_ref, lb_ref,
                      cls_ref, loss_ref):
    """Vision post-LN + cls head + projections + pooling + L2 + SigLIP loss."""
    vis = vis_ref[...].astype(jnp.float32)                # (B, N, D)
    b, n, d = vis.shape
    vis_ln = _ln2d(vis.reshape(b * n, d), post_g[...], post_b[...])
    vis_ln = vis_ln.reshape(b, n, d)

    # cls head on token 0, written as a lane-dense 128-wide slab.
    cls_tok = vis_ln[:, 0, :]                             # (B, D)
    cls_ref[...] = jnp.dot(cls_tok.astype(jnp.bfloat16), w_cls[...],
                           preferred_element_type=jnp.float32) + b_cls[...]

    # pooling first, projection after (affine commutes with (masked) mean).
    img_pool = jnp.mean(vis_ln, axis=1)                   # (B, D)

    txt = txt_ref[...].astype(jnp.float32)                # (B, S, Dt)
    bt, s, dt = txt.shape
    txt_ln = _ln2d(txt.reshape(bt * s, dt), fin_g[...], fin_b[...])
    txt_ln = txt_ln.reshape(bt, s, dt)
    m = mask_ref[...]                                     # (B, S) lane-dense
    cnt = jnp.maximum(jnp.sum(m, axis=1, keepdims=True), 1.0)      # (B, 1)
    # TODO(synk): replace this static batch unroll with a batched dot_general
    # (or a grid axis) once the batch is larger than a handful of rows.
    rows = [jnp.dot(m[bi:bi + 1, :], txt_ln[bi],
                    preferred_element_type=jnp.float32) for bi in range(bt)]
    txt_pool = jnp.concatenate(rows, axis=0) / cnt        # (B, Dt)

    img_lat = jnp.dot(img_pool.astype(jnp.bfloat16), w_ip[...],
                      preferred_element_type=jnp.float32) + b_ip[...]
    txt_lat = jnp.dot(txt_pool.astype(jnp.bfloat16), w_tp[...],
                      preferred_element_type=jnp.float32) + b_tp[...]
    img_n = img_lat * jax.lax.rsqrt(
        jnp.sum(img_lat * img_lat, axis=-1, keepdims=True) + 1e-12)
    txt_n = txt_lat * jax.lax.rsqrt(
        jnp.sum(txt_lat * txt_lat, axis=-1, keepdims=True) + 1e-12)

    t = jnp.exp(t_ref[0, 0])
    bias = lb_ref[0, 0]
    logits = jax.lax.dot_general(
        img_n, txt_n, (((1,), (1,)), ((), ())),
        preferred_element_type=jnp.float32) * t + bias             # (B, B)
    row = jax.lax.broadcasted_iota(jnp.int32, logits.shape, 0)
    col = jax.lax.broadcasted_iota(jnp.int32, logits.shape, 1)
    labels = jnp.where(row == col, 1.0, -1.0)
    neg = -labels * logits
    # -log sigmoid(z) = softplus(-z), computed stably.
    nll = jnp.maximum(neg, 0.0) + jnp.log1p(jnp.exp(-jnp.abs(neg)))
    loss_ref[0, 0] = jnp.sum(nll) / logits.shape[0]


# ------------------------------ wrappers ------------------------------------
def patch_embed(patches, w, b, pos):
    bsz, n, cpp = patches.shape
    d = w.shape[1]
    return pl.pallas_call(
        _patch_embed_kernel,
        grid=(bsz,),
        out_shape=jax.ShapeDtypeStruct((bsz, n, d), jnp.bfloat16),
        in_specs=[pl.BlockSpec((1, n, cpp), lambda i: (i, 0, 0)),
                  _const_spec(w), _const_spec(b), _const_spec(pos)],
        out_specs=pl.BlockSpec((1, n, d), lambda i: (i, 0, 0)),
        compiler_params=pltpu.CompilerParams(
            dimension_semantics=("parallel",),
            vmem_limit_bytes=VMEM_LIMIT),
    )(patches, w, b, pos)


def fused_transformer_layer(x, p, attn_bias=None):
    b, s, d = x.shape
    head_dim = d // N_HEADS
    has_mask = attn_bias is not None

    args = [x]
    in_specs = [pl.BlockSpec((1, s, d), lambda i: (i, 0, 0))]
    if has_mask:
        args.append(attn_bias)
        in_specs.append(pl.BlockSpec((1, 1, s), lambda i: (i, 0, 0)))
    for name in ("ln1_g", "ln1_b", "wqkv", "bqkv", "wo", "bo",
                 "ln2_g", "ln2_b", "w1", "b1", "w2", "b2"):
        args.append(p[name])
        in_specs.append(_const_spec(p[name]))

    kernel = functools.partial(
        _fused_layer_kernel, n_heads=N_HEADS, head_dim=head_dim,
        has_mask=has_mask)
    # TODO(synk): at real sizes add a cross-pallas_call weight prefetch
    # (semaphore + VMEM outputs) so next-layer weight DMA hides behind compute.
    return pl.pallas_call(
        kernel,
        grid=(b,),
        out_shape=jax.ShapeDtypeStruct((b, s, d), jnp.bfloat16),
        in_specs=in_specs,
        out_specs=pl.BlockSpec((1, s, d), lambda i: (i, 0, 0)),
        compiler_params=pltpu.CompilerParams(
            dimension_semantics=("parallel",),
            vmem_limit_bytes=VMEM_LIMIT),
    )(*args)


def head_and_loss(vis, txt, pool_mask, params):
    b = vis.shape[0]
    return pl.pallas_call(
        _head_loss_kernel,
        out_shape=(jax.ShapeDtypeStruct((b, CLS_PAD), jnp.float32),
                   jax.ShapeDtypeStruct((1, 1), jnp.float32)),
        in_specs=[pl.BlockSpec(memory_space=VMEM)] * 13
        + [pl.BlockSpec(memory_space=SMEM)] * 2,
        out_specs=(pl.BlockSpec(memory_space=VMEM),
                   pl.BlockSpec(memory_space=SMEM)),
        compiler_params=pltpu.CompilerParams(vmem_limit_bytes=VMEM_LIMIT),
    )(vis, txt, pool_mask,
      params["vision"]["post_ln_g"], params["vision"]["post_ln_b"],
      params["text"]["final_ln_g"], params["text"]["final_ln_b"],
      params["w_cls"], params["b_cls"],
      params["w_img_proj"], params["b_img_proj"],
      params["w_txt_proj"], params["b_txt_proj"],
      params["logit_scale"], params["logit_bias"])


# ------------------------------ forward pass --------------------------------
def siglip_model_forward(params, images, input_ids, attention_mask):
    v = params["vision"]
    b = images.shape[0]

    # patchify NCHW -> [B, N, C*P*P] (equivalent to the stride-P conv embed).
    # TODO(synk): fold this 6-D transpose into the patch-embed DMA via a
    # BlockSpec index_map / manual gather at real SigLIP sizes.
    patches = images.reshape(b, C, IMG // PATCH, PATCH, IMG // PATCH, PATCH)
    patches = patches.transpose(0, 2, 4, 1, 3, 5).reshape(
        b, N_PATCH, C * PATCH * PATCH)

    x = patch_embed(patches, v["w_patch"], v["b_patch"], v["pos_emb"])
    for lp in v["layers"]:                      # vision tower: mask-free attn
        x = fused_transformer_layer(x, lp)

    t = params["text"]
    # TODO(synk): embedding gather (data-dependent) stays in plain JAX.
    y = (jnp.take(t["emb"], input_ids, axis=0) + t["pos_emb"]).astype(
        jnp.bfloat16)
    attn_bias = ((attention_mask.astype(jnp.float32) - 1.0) * 1e9)[:, None, :]
    for lp in t["layers"]:
        y = fused_transformer_layer(y, lp, attn_bias)

    pool_mask = attention_mask.astype(jnp.float32)           # (B, S) lane-dense
    cls_slab, loss = head_and_loss(x, y, pool_mask, params)
    return cls_slab[:, :N_CLASSES], loss[0, 0]


# ------------------------------ parameters ----------------------------------
def _w(k, shape):
    return jax.random.normal(k, shape, jnp.float32) * 0.02


def init_layer(key, d, mlp):
    ks = jax.random.split(key, 6)
    return dict(
        ln1_g=jnp.ones((d,), jnp.float32), ln1_b=jnp.zeros((d,), jnp.float32),
        wq=_w(ks[0], (d, d)), bq=jnp.zeros((d,), jnp.float32),
        wk=_w(ks[1], (d, d)), bk=jnp.zeros((d,), jnp.float32),
        wv=_w(ks[2], (d, d)), bv=jnp.zeros((d,), jnp.float32),
        wo=_w(ks[3], (d, d)), bo=jnp.zeros((d,), jnp.float32),
        ln2_g=jnp.ones((d,), jnp.float32), ln2_b=jnp.zeros((d,), jnp.float32),
        w1=_w(ks[4], (d, mlp)), b1=jnp.zeros((mlp,), jnp.float32),
        w2=_w(ks[5], (mlp, d)), b2=jnp.zeros((d,), jnp.float32),
    )


def init_params(key):
    keys = jax.random.split(key, 10)
    vision = dict(
        w_patch=_w(keys[1], (C * PATCH * PATCH, D)),
        b_patch=jnp.zeros((D,), jnp.float32),
        pos_emb=_w(keys[2], (1, N_PATCH, D)),
        layers=[init_layer(k, D, MLP_DIM)
                for k in jax.random.split(keys[0], N_VIS_LAYERS)],
        post_ln_g=jnp.ones((D,), jnp.float32),
        post_ln_b=jnp.zeros((D,), jnp.float32),
    )
    text = dict(
        emb=_w(keys[4], (VOCAB, D_TXT)),
        pos_emb=_w(keys[5], (1, S_TXT, D_TXT)),
        layers=[init_layer(k, D_TXT, MLP_DIM)
                for k in jax.random.split(keys[3], N_TXT_LAYERS)],
        final_ln_g=jnp.ones((D_TXT,), jnp.float32),
        final_ln_b=jnp.zeros((D_TXT,), jnp.float32),
    )
    return dict(
        vision=vision,
        text=text,
        w_cls=_w(keys[6], (D, N_CLASSES)),
        b_cls=jnp.zeros((N_CLASSES,), jnp.float32),
        w_img_proj=_w(keys[7], (D, LATENT)),
        b_img_proj=jnp.zeros((LATENT,), jnp.float32),
        w_txt_proj=_w(keys[8], (D_TXT, LATENT)),
        b_txt_proj=jnp.zeros((LATENT,), jnp.float32),
        logit_scale=jnp.full((1, 1), math.log(10.0), jnp.float32),
        logit_bias=jnp.full((1, 1), -10.0, jnp.float32),
    )


def _pack_layer(lp, n_heads):
    """Fuse Q/K/V (with attention scale folded into wq/bq), cast matmul
    weights to bf16, reshape biases/LN params to (1, N)."""
    d = lp["wq"].shape[0]
    scale = 1.0 / math.sqrt(d // n_heads)
    wq = lp["wq"] * scale
    bq = lp["bq"] * scale
    return dict(
        ln1_g=lp["ln1_g"].reshape(1, -1), ln1_b=lp["ln1_b"].reshape(1, -1),
        wqkv=jnp.concatenate([wq, lp["wk"], lp["wv"]],
                             axis=1).astype(jnp.bfloat16),
        bqkv=jnp.concatenate([bq, lp["bk"], lp["bv"]]).reshape(1, -1),
        wo=lp["wo"].astype(jnp.bfloat16), bo=lp["bo"].reshape(1, -1),
        ln2_g=lp["ln2_g"].reshape(1, -1), ln2_b=lp["ln2_b"].reshape(1, -1),
        w1=lp["w1"].astype(jnp.bfloat16), b1=lp["b1"].reshape(1, -1),
        w2=lp["w2"].astype(jnp.bfloat16), b2=lp["b2"].reshape(1, -1),
    )


def pack_params(p):
    """One-time (outside jit) kernel-ready packing of parameters."""
    vision = dict(
        w_patch=p["vision"]["w_patch"].astype(jnp.bfloat16),
        b_patch=p["vision"]["b_patch"].reshape(1, -1),
        pos_emb=p["vision"]["pos_emb"],
        layers=[_pack_layer(lp, N_HEADS) for lp in p["vision"]["layers"]],
        post_ln_g=p["vision"]["post_ln_g"].reshape(1, -1),
        post_ln_b=p["vision"]["post_ln_b"].reshape(1, -1),
    )
    text = dict(
        emb=p["text"]["emb"],
        pos_emb=p["text"]["pos_emb"],
        layers=[_pack_layer(lp, N_HEADS) for lp in p["text"]["layers"]],
        final_ln_g=p["text"]["final_ln_g"].reshape(1, -1),
        final_ln_b=p["text"]["final_ln_b"].reshape(1, -1),
    )
    # cls head: pad to a lane-dense 128-wide output slab.
    w_cls = jnp.zeros((D, CLS_PAD), jnp.float32)
    w_cls = w_cls.at[:, :N_CLASSES].set(p["w_cls"]).astype(jnp.bfloat16)
    b_cls = jnp.zeros((1, CLS_PAD), jnp.float32)
    b_cls = b_cls.at[:, :N_CLASSES].set(p["b_cls"])
    # TODO(synk): on v7x, per-channel-scaled fp8 weights for QKV/MLP are a
    # further 2x MXU / DMA lever (not applicable to v5e/v6e).
    return dict(
        vision=vision,
        text=text,
        w_cls=w_cls, b_cls=b_cls,
        w_img_proj=p["w_img_proj"].astype(jnp.bfloat16),
        b_img_proj=p["b_img_proj"].reshape(1, -1),
        w_txt_proj=p["w_txt_proj"].astype(jnp.bfloat16),
        b_txt_proj=p["b_txt_proj"].reshape(1, -1),
        logit_scale=p["logit_scale"],
        logit_bias=p["logit_bias"],
    )


# --------------------------------- main -------------------------------------
if __name__ == "__main__":
    key = jax.random.PRNGKey(0)
    pkey, ikey, tkey = jax.random.split(key, 3)
    params = pack_params(init_params(pkey))

    images = jax.random.normal(ikey, (B, C, IMG, IMG), jnp.float32)   # NCHW
    input_ids = jax.random.randint(tkey, (B, S_TXT), 0, VOCAB, dtype=jnp.int32)
    attention_mask = jnp.concatenate(
        [jnp.ones((B, S_TXT - 2), jnp.int32), jnp.zeros((B, 2), jnp.int32)],
        axis=1)

    cls_logits, align_loss = jax.jit(siglip_model_forward)(
        params, images, input_ids, attention_mask)
    jax.block_until_ready((cls_logits, align_loss))
    assert cls_logits.shape == (B, N_CLASSES)
    assert align_loss.shape == ()
    print("KERNEL_OK")
</pallas_src>

<mosaic_0001>
module attributes {stable_mosaic.version = 11 : i64} {
  func.func @_patch_embed_kernel(%arg0: i32, %arg1: memref<1x4x192xf32, #tpu.memory_space<vmem>>, %arg2: memref<192x32xbf16, #tpu.memory_space<vmem>>, %arg3: memref<1x32xf32, #tpu.memory_space<vmem>>, %arg4: memref<1x4x32xf32, #tpu.memory_space<vmem>>, %arg5: memref<1x4x32xbf16, #tpu.memory_space<vmem>>) attributes {dimension_semantics = [#tpu.dimension_semantics<parallel>], iteration_bounds = array<i64: 2>, scalar_prefetch = 0 : i64, scratch_operands = 0 : i64, tpu.core_type = #tpu.core_type<tc>, window_params = [{transform_indices = @transform_0, window_bounds = array<i64: 1, 4, 192>}, {pipeline_mode = #tpu.pipeline_mode<synchronous>, transform_indices = @transform_1, window_bounds = array<i64: 192, 32>}, {pipeline_mode = #tpu.pipeline_mode<synchronous>, transform_indices = @transform_2, window_bounds = array<i64: 1, 32>}, {pipeline_mode = #tpu.pipeline_mode<synchronous>, transform_indices = @transform_3, window_bounds = array<i64: 1, 4, 32>}, {transform_indices = @transform_4, window_bounds = array<i64: 1, 4, 32>}]} {
    %c0 = arith.constant 0 : index
    %c0_0 = arith.constant 0 : index
    %c0_1 = arith.constant 0 : index
    %0 = vector.load %arg1[%c0, %c0_0, %c0_1] : memref<1x4x192xf32, #tpu.memory_space<vmem>>, vector<1x4x192xf32>
    %1 = vector.shape_cast %0 : vector<1x4x192xf32> to vector<4x192xf32>
    %2 = arith.truncf %1 : vector<4x192xf32> to vector<4x192xbf16>
    %c0_2 = arith.constant 0 : index
    %c0_3 = arith.constant 0 : index
    %3 = vector.load %arg2[%c0_2, %c0_3] : memref<192x32xbf16, #tpu.memory_space<vmem>>, vector<192x32xbf16>
    %cst = arith.constant dense<0.000000e+00> : vector<4x32xf32>
    %4 = tpu.matmul %2, %3, %cst {dimension_numbers = #tpu.dot_dimension_numbers<[1], [0], [0], [1], [0, 0, 1, 1], [], []>} : vector<4x192xbf16>, vector<192x32xbf16>, vector<4x32xf32> -> vector<4x32xf32>
    %c0_4 = arith.constant 0 : index
    %c0_5 = arith.constant 0 : index
    %5 = vector.load %arg3[%c0_4, %c0_5] : memref<1x32xf32, #tpu.memory_space<vmem>>, vector<1x32xf32>
    %6 = vector.broadcast %5 : vector<1x32xf32> to vector<4x32xf32>
    %7 = arith.addf %4, %6 : vector<4x32xf32>
    %c0_6 = arith.constant 0 : index
    %c0_7 = arith.constant 0 : index
    %c0_8 = arith.constant 0 : index
    %8 = vector.load %arg4[%c0_6, %c0_7, %c0_8] : memref<1x4x32xf32, #tpu.memory_space<vmem>>, vector<1x4x32xf32>
    %9 = vector.shape_cast %8 : vector<1x4x32xf32> to vector<4x32xf32>
    %10 = arith.addf %7, %9 : vector<4x32xf32>
    %11 = vector.shape_cast %10 : vector<4x32xf32> to vector<1x4x32xf32>
    %12 = arith.truncf %11 : vector<1x4x32xf32> to vector<1x4x32xbf16>
    %c0_9 = arith.constant 0 : index
    %c0_10 = arith.constant 0 : index
    %c0_11 = arith.constant 0 : index
    %13 = vector.load %arg5[%c0_9, %c0_10, %c0_11] : memref<1x4x32xbf16, #tpu.memory_space<vmem>>, vector<1x4x32xbf16>
    tpu.vector_store %arg5[%c0_9, %c0_10, %c0_11], %12 {strides = array<i32>} : memref<1x4x32xbf16, #tpu.memory_space<vmem>>, vector<1x4x32xbf16>,
    return
  }
  func.func @transform_0(%arg0: i32) -> (i32, i32, i32) {
    %c0_i32 = arith.constant 0 : i32
    %c0_i32_0 = arith.constant 0 : i32
    %c0_i32_1 = arith.constant 0 : i32
    return %arg0, %c0_i32, %c0_i32_0 : i32, i32, i32
  }
  func.func @transform_1(%arg0: i32) -> (i32, i32) {
    %c0_i32 = arith.constant 0 : i32
    %c0_i32_0 = arith.constant 0 : i32
    %c0_i32_1 = arith.constant 0 : i32
    return %c0_i32, %c0_i32_0 : i32, i32
  }
  func.func @transform_2(%arg0: i32) -> (i32, i32) {
    %c0_i32 = arith.constant 0 : i32
    %c0_i32_0 = arith.constant 0 : i32
    %c0_i32_1 = arith.constant 0 : i32
    return %c0_i32, %c0_i32_0 : i32, i32
  }
  func.func @transform_3(%arg0: i32) -> (i32, i32, i32) {
    %c0_i32 = arith.constant 0 : i32
    %c0_i32_0 = arith.constant 0 : i32
    %c0_i32_1 = arith.constant 0 : i32
    %c0_i32_2 = arith.constant 0 : i32
    return %c0_i32, %c0_i32_0, %c0_i32_1 : i32, i32, i32
  }
  func.func @transform_4(%arg0: i32) -> (i32, i32, i32) {
    %c0_i32 = arith.constant 0 : i32
    %c0_i32_0 = arith.constant 0 : i32
    %c0_i32_1 = arith.constant 0 : i32
    return %arg0, %c0_i32, %c0_i32_0 : i32, i32, i32
  }
}

module attributes {stable_mosaic.version = 11 : i64} {
  func.func @_fused_layer_kernel(%arg0: i32, %arg1: memref<1x4x32xbf16, #tpu.memory_space<vmem>>, %arg2: memref<1x32xf32, #tpu.memory_space<vmem>>, %arg3: memref<1x32xf32, #tpu.memory_space<vmem>>, %arg4: memref<32x96xbf16, #tpu.memory_space<vmem>>, %arg5: memref<1x96xf32, #tpu.memory_space<vmem>>, %arg6: memref<32x32xbf16, #tpu.memory_space<vmem>>, %arg7: memref<1x32xf32, #tpu.memory_space<vmem>>, %arg8: memref<1x32xf32, #tpu.memory_space<vmem>>, %arg9: memref<1x32xf32, #tpu.memory_space<vmem>>, %arg10: memref<32x64xbf16, #tpu.memory_space<vmem>>, %arg11: memref<1x64xf32, #tpu.memory_space<vmem>>, %arg12: memref<64x32xbf16, #tpu.memory_space<vmem>>, %arg13: memref<1x32xf32, #tpu.memory_space<vmem>>, %arg14: memref<1x4x32xbf16, #tpu.memory_space<vmem>>) attributes {dimension_semantics = [#tpu.dimension_semantics<parallel>], iteration_bounds = array<i64: 2>, scalar_prefetch = 0 : i64, scratch_operands = 0 : i64, tpu.core_type = #tpu.core_type<tc>, window_params = [{transform_indices = @transform_0, window_bounds = array<i64: 1, 4, 32>}, {pipeline_mode = #tpu.pipeline_mode<synchronous>, transform_indices = @transform_1, window_bounds = array<i64: 1, 32>}, {pipeline_mode = #tpu.pipeline_mode<synchronous>, transform_indices = @transform_2, window_bounds = array<i64: 1, 32>}, {pipeline_mode = #tpu.pipeline_mode<synchronous>, transform_indices = @transform_3, window_bounds = array<i64: 32, 96>}, {pipeline_mode = #tpu.pipeline_mode<synchronous>, transform_indices = @transform_4, window_bounds = array<i64: 1, 96>}, {pipeline_mode = #tpu.pipeline_mode<synchronous>, transform_indices = @transform_5, window_bounds = array<i64: 32, 32>}, {pipeline_mode = #tpu.pipeline_mode<synchronous>, transform_indices = @transform_6, window_bounds = array<i64: 1, 32>}, {pipeline_mode = #tpu.pipeline_mode<synchronous>, transform_indices = @transform_7, window_bounds = array<i64: 1, 32>}, {pipeline_mode = #tpu.pipeline_mode<synchronous>, transform_indices = @transform_8, window_bounds = array<i64: 1, 32>}, {pipeline_mode = #tpu.pipeline_mode<synchronous>, transform_indices = @transform_9, window_bounds = array<i64: 32, 64>}, {pipeline_mode = #tpu.pipeline_mode<synchronous>, transform_indices = @transform_10, window_bounds = array<i64: 1, 64>}, {pipeline_mode = #tpu.pipeline_mode<synchronous>, transform_indices = @transform_11, window_bounds = array<i64: 64, 32>}, {pipeline_mode = #tpu.pipeline_mode<synchronous>, transform_indices = @transform_12, window_bounds = array<i64: 1, 32>}, {transform_indices = @transform_13, window_bounds = array<i64: 1, 4, 32>}]} {
    %c0 = arith.constant 0 : index
    %c0_0 = arith.constant 0 : index
    %c0_1 = arith.constant 0 : index
    %0 = vector.load %arg1[%c0, %c0_0, %c0_1] : memref<1x4x32xbf16, #tpu.memory_space<vmem>>, vector<1x4x32xbf16>
    %1 = vector.shape_cast %0 : vector<1x4x32xbf16> to vector<4x32xbf16>
    %2 = arith.extf %1 : vector<4x32xbf16> to vector<4x32xf32>
    %c0_2 = arith.constant 0 : index
    %c0_3 = arith.constant 0 : index
    %3 = vector.load %arg2[%c0_2, %c0_3] : memref<1x32xf32, #tpu.memory_space<vmem>>, vector<1x32xf32>
    %c0_4 = arith.constant 0 : index
    %c0_5 = arith.constant 0 : index
    %4 = vector.load %arg3[%c0_4, %c0_5] : memref<1x32xf32, #tpu.memory_space<vmem>>, vector<1x32xf32>
    %cst = arith.constant dense<0.000000e+00> : vector<4xf32>
    %5 = vector.multi_reduction <add>, %2, %cst [1] : vector<4x32xf32> to vector<4xf32>
    %6 = vector.shape_cast %5 : vector<4xf32> to vector<4x1xf32>
    %cst_6 = arith.constant 3.200000e+01 : f32
    %7 = vector.broadcast %cst_6 : f32 to vector<4x1xf32>
    %8 = arith.divf %6, %7 : vector<4x1xf32>
    %9 = vector.broadcast %8 : vector<4x1xf32> to vector<4x32xf32>
    %10 = arith.subf %2, %9 : vector<4x32xf32>
    %11 = arith.mulf %10, %10 : vector<4x32xf32>
    %cst_7 = arith.constant dense<0.000000e+00> : vector<4xf32>
    %12 = vector.multi_reduction <add>, %11, %cst_7 [1] : vector<4x32xf32> to vector<4xf32>
    %13 = vector.shape_cast %12 : vector<4xf32> to vector<4x1xf32>
    %cst_8 = arith.constant 3.200000e+01 : f32
    %14 = vector.broadcast %cst_8 : f32 to vector<4x1xf32>
    %15 = arith.divf %13, %14 : vector<4x1xf32>
    %16 = vector.broadcast %8 : vector<4x1xf32> to vector<4x32xf32>
    %17 = arith.subf %2, %16 : vector<4x32xf32>
    %cst_9 = arith.constant 9.99999997E-7 : f32
    %18 = vector.broadcast %cst_9 : f32 to vector<4x1xf32>
    %19 = arith.addf %15, %18 : vector<4x1xf32>
    %20 = math.rsqrt %19 : vector<4x1xf32>
    %21 = vector.broadcast %20 : vector<4x1xf32> to vector<4x32xf32>
    %22 = arith.mulf %17, %21 : vector<4x32xf32>
    %23 = vector.broadcast %3 : vector<1x32xf32> to vector<4x32xf32>
    %24 = arith.mulf %22, %23 : vector<4x32xf32>
    %25 = vector.broadcast %4 : vector<1x32xf32> to vector<4x32xf32>
    %26 = arith.addf %24, %25 : vector<4x32xf32>
    %27 = arith.truncf %26 : vector<4x32xf32> to vector<4x32xbf16>
    %c0_10 = arith.constant 0 : index
    %c0_11 = arith.constant 0 : index
    %28 = vector.load %arg4[%c0_10, %c0_11] : memref<32x96xbf16, #tpu.memory_space<vmem>>, vector<32x96xbf16>
    %cst_12 = arith.constant dense<0.000000e+00> : vector<4x96xf32>
    %29 = tpu.matmul %27, %28, %cst_12 {dimension_numbers = #tpu.dot_dimension_numbers<[1], [0], [0], [1], [0, 0, 1, 1], [], []>} : vector<4x32xbf16>, vector<32x96xbf16>, vector<4x96xf32> -> vector<4x96xf32>
    %c0_13 = arith.constant 0 : index
    %c0_14 = arith.constant 0 : index
    %30 = vector.load %arg5[%c0_13, %c0_14] : memref<1x96xf32, #tpu.memory_space<vmem>>, vector<1x96xf32>
    %31 = vector.broadcast %30 : vector<1x96xf32> to vector<4x96xf32>
    %32 = arith.addf %29, %31 : vector<4x96xf32>
    %c0_15 = arith.constant 0 : index
    %c0_16 = arith.constant 0 : index
    %33 = vector.load %arg6[%c0_15, %c0_16] : memref<32x32xbf16, #tpu.memory_space<vmem>>, vector<32x32xbf16>
    %cst_17 = arith.constant 0.000000e+00 : f32
    %34 = vector.broadcast %cst_17 : f32 to vector<4x32xf32>
    %35 = vector.extract_strided_slice %32 {offsets = [0, 0], sizes = [4, 16], strides = [1, 1]} : vector<4x96xf32> to vector<4x16xf32>
    %36 = arith.truncf %35 : vector<4x16xf32> to vector<4x16xbf16>
    %37 = vector.extract_strided_slice %32 {offsets = [0, 32], sizes = [4, 16], strides = [1, 1]} : vector<4x96xf32> to vector<4x16xf32>
    %38 = arith.truncf %37 : vector<4x16xf32> to vector<4x16xbf16>
    %39 = vector.extract_strided_slice %32 {offsets = [0, 64], sizes = [4, 16], strides = [1, 1]} : vector<4x96xf32> to vector<4x16xf32>
    %40 = arith.truncf %39 : vector<4x16xf32> to vector<4x16xbf16>
    %cst_18 = arith.constant dense<0.000000e+00> : vector<4x4xf32>
    %41 = tpu.matmul %36, %38, %cst_18 {dimension_numbers = #tpu.dot_dimension_numbers<[1], [1], [0], [0], [0, 0, 1, 0], [], []>} : vector<4x16xbf16>, vector<4x16xbf16>, vector<4x4xf32> -> vector<4x4xf32>
    %cst_19 = arith.constant dense<0xFF800000> : vector<4xf32>
    %42 = vector.multi_reduction <maximumf>, %41, %cst_19 [1] : vector<4x4xf32> to vector<4xf32>
    %43 = vector.shape_cast %42 : vector<4xf32> to vector<4x1xf32>
    %44 = vector.broadcast %43 : vector<4x1xf32> to vector<4x4xf32>
    %45 = arith.subf %41, %44 : vector<4x4xf32>
    %46 = math.exp %45 : vector<4x4xf32>
    %cst_20 = arith.constant dense<0.000000e+00> : vector<4xf32>
    %47 = vector.multi_reduction <add>, %46, %cst_20 [1] : vector<4x4xf32> to vector<4xf32>
    %48 = vector.shape_cast %47 : vector<4xf32> to vector<4x1xf32>
    %49 = tpu.reciprocal %48 {approx = true} : vector<4x1xf32> -> vector<4x1xf32>
    %50 = vector.broadcast %49 : vector<4x1xf32> to vector<4x4xf32>
    %51 = arith.mulf %46, %50 : vector<4x4xf32>
    %52 = arith.truncf %51 : vector<4x4xf32> to vector<4x4xbf16>
    %cst_21 = arith.constant dense<0.000000e+00> : vector<4x16xf32>
    %53 = tpu.matmul %52, %40, %cst_21 {dimension_numbers = #tpu.dot_dimension_numbers<[1], [0], [0], [1], [0, 0, 1, 1], [], []>} : vector<4x4xbf16>, vector<4x16xbf16>, vector<4x16xf32> -> vector<4x16xf32>
    %54 = arith.truncf %53 : vector<4x16xf32> to vector<4x16xbf16>
    %55 = vector.extract_strided_slice %33 {offsets = [0, 0], sizes = [16, 32], strides = [1, 1]} : vector<32x32xbf16> to vector<16x32xbf16>
    %cst_22 = arith.constant dense<0.000000e+00> : vector<4x32xf32>
    %56 = tpu.matmul %54, %55, %cst_22 {dimension_numbers = #tpu.dot_dimension_numbers<[1], [0], [0], [1], [0, 0, 1, 1], [], []>} : vector<4x16xbf16>, vector<16x32xbf16>, vector<4x32xf32> -> vector<4x32xf32>
    %57 = arith.addf %34, %56 : vector<4x32xf32>
    %58 = vector.extract_strided_slice %32 {offsets = [0, 16], sizes = [4, 16], strides = [1, 1]} : vector<4x96xf32> to vector<4x16xf32>
    %59 = arith.truncf %58 : vector<4x16xf32> to vector<4x16xbf16>
    %60 = vector.extract_strided_slice %32 {offsets = [0, 48], sizes = [4, 16], strides = [1, 1]} : vector<4x96xf32> to vector<4x16xf32>
    %61 = arith.truncf %60 : vector<4x16xf32> to vector<4x16xbf16>
    %62 = vector.extract_strided_slice %32 {offsets = [0, 80], sizes = [4, 16], strides = [1, 1]} : vector<4x96xf32> to vector<4x16xf32>
    %63 = arith.truncf %62 : vector<4x16xf32> to vector<4x16xbf16>
    %cst_23 = arith.constant dense<0.000000e+00> : vector<4x4xf32>
    %64 = tpu.matmul %59, %61, %cst_23 {dimension_numbers = #tpu.dot_dimension_numbers<[1], [1], [0], [0], [0, 0, 1, 0], [], []>} : vector<4x16xbf16>, vector<4x16xbf16>, vector<4x4xf32> -> vector<4x4xf32>
    %cst_24 = arith.constant dense<0xFF800000> : vector<4xf32>
    %65 = vector.multi_reduction <maximumf>, %64, %cst_24 [1] : vector<4x4xf32> to vector<4xf32>
    %66 = vector.shape_cast %65 : vector<4xf32> to vector<4x1xf32>
    %67 = vector.broadcast %66 : vector<4x1xf32> to vector<4x4xf32>
    %68 = arith.subf %64, %67 : vector<4x4xf32>
    %69 = math.exp %68 : vector<4x4xf32>
    %cst_25 = arith.constant dense<0.000000e+00> : vector<4xf32>
    %70 = vector.multi_reduction <add>, %69, %cst_25 [1] : vector<4x4xf32> to vector<4xf32>
    %71 = vector.shape_cast %70 : vector<4xf32> to vector<4x1xf32>
    %72 = tpu.reciprocal %71 {approx = true} : vector<4x1xf32> -> vector<4x1xf32>
    %73 = vector.broadcast %72 : vector<4x1xf32> to vector<4x4xf32>
    %74 = arith.mulf %69, %73 : vector<4x4xf32>
    %75 = arith.truncf %74 : vector<4x4xf32> to vector<4x4xbf16>
    %cst_26 = arith.constant dense<0.000000e+00> : vector<4x16xf32>
    %76 = tpu.matmul %75, %63, %cst_26 {dimension_numbers = #tpu.dot_dimension_numbers<[1], [0], [0], [1], [0, 0, 1, 1], [], []>} : vector<4x4xbf16>, vector<4x16xbf16>, vector<4x16xf32> -> vector<4x16xf32>
    %77 = arith.truncf %76 : vector<4x16xf32> to vector<4x16xbf16>
    %78 = vector.extract_strided_slice %33 {offsets = [16, 0], sizes = [16, 32], strides = [1, 1]} : vector<32x32xbf16> to vector<16x32xbf16>
    %cst_27 = arith.constant dense<0.000000e+00> : vector<4x32xf32>
    %79 = tpu.matmul %77, %78, %cst_27 {dimension_numbers = #tpu.dot_dimension_numbers<[1], [0], [0], [1], [0, 0, 1, 1], [], []>} : vector<4x16xbf16>, vector<16x32xbf16>, vector<4x32xf32> -> vector<4x32xf32>
    %80 = arith.addf %57, %79 : vector<4x32xf32>
    %81 = arith.addf %2, %80 : vector<4x32xf32>
    %c0_28 = arith.constant 0 : index
    %c0_29 = arith.constant 0 : index
    %82 = vector.load %arg7[%c0_28, %c0_29] : memref<1x32xf32, #tpu.memory_space<vmem>>, vector<1x32xf32>
    %83 = vector.broadcast %82 : vector<1x32xf32> to vector<4x32xf32>
    %84 = arith.addf %81, %83 : vector<4x32xf32>
    %c0_30 = arith.constant 0 : index
    %c0_31 = arith.constant 0 : index
    %85 = vector.load %arg8[%c0_30, %c0_31] : memref<1x32xf32, #tpu.memory_space<vmem>>, vector<1x32xf32>
    %c0_32 = arith.constant 0 : index
    %c0_33 = arith.constant 0 : index
    %86 = vector.load %arg9[%c0_32, %c0_33] : memref<1x32xf32, #tpu.memory_space<vmem>>, vector<1x32xf32>
    %cst_34 = arith.constant dense<0.000000e+00> : vector<4xf32>
    %87 = vector.multi_reduction <add>, %84, %cst_34 [1] : vector<4x32xf32> to vector<4xf32>
    %88 = vector.shape_cast %87 : vector<4xf32> to vector<4x1xf32>
    %cst_35 = arith.constant 3.200000e+01 : f32
    %89 = vector.broadcast %cst_35 : f32 to vector<4x1xf32>
    %90 = arith.divf %88, %89 : vector<4x1xf32>
    %91 = vector.broadcast %90 : vector<4x1xf32> to vector<4x32xf32>
    %92 = arith.subf %84, %91 : vector<4x32xf32>
    %93 = arith.mulf %92, %92 : vector<4x32xf32>
    %cst_36 = arith.constant dense<0.000000e+00> : vector<4xf32>
    %94 = vector.multi_reduction <add>, %93, %cst_36 [1] : vector<4x32xf32> to vector<4xf32>
    %95 = vector.shape_cast %94 : vector<4xf32> to vector<4x1xf32>
    %cst_37 = arith.constant 3.200000e+01 : f32
    %96 = vector.broadcast %cst_37 : f32 to vector<4x1xf32>
    %97 = arith.divf %95, %96 : vector<4x1xf32>
    %98 = vector.broadcast %90 : vector<4x1xf32> to vector<4x32xf32>
    %99 = arith.subf %84, %98 : vector<4x32xf32>
    %cst_38 = arith.constant 9.99999997E-7 : f32
    %100 = vector.broadcast %cst_38 : f32 to vector<4x1xf32>
    %101 = arith.addf %97, %100 : vector<4x1xf32>
    %102 = math.rsqrt %101 : vector<4x1xf32>
    %103 = vector.broadcast %102 : vector<4x1xf32> to vector<4x32xf32>
    %104 = arith.mulf %99, %103 : vector<4x32xf32>
    %105 = vector.broadcast %85 : vector<1x32xf32> to vector<4x32xf32>
    %106 = arith.mulf %104, %105 : vector<4x32xf32>
    %107 = vector.broadcast %86 : vector<1x32xf32> to vector<4x32xf32>
    %108 = arith.addf %106, %107 : vector<4x32xf32>
    %109 = arith.truncf %108 : vector<4x32xf32> to vector<4x32xbf16>
    %c0_39 = arith.constant 0 : index
    %c0_40 = arith.constant 0 : index
    %110 = vector.load %arg10[%c0_39, %c0_40] : memref<32x64xbf16, #tpu.memory_space<vmem>>, vector<32x64xbf16>
    %cst_41 = arith.constant dense<0.000000e+00> : vector<4x64xf32>
    %111 = tpu.matmul %109, %110, %cst_41 {dimension_numbers = #tpu.dot_dimension_numbers<[1], [0], [0], [1], [0, 0, 1, 1], [], []>} : vector<4x32xbf16>, vector<32x64xbf16>, vector<4x64xf32> -> vector<4x64xf32>
    %c0_42 = arith.constant 0 : index
    %c0_43 = arith.constant 0 : index
    %112 = vector.load %arg11[%c0_42, %c0_43] : memref<1x64xf32, #tpu.memory_space<vmem>>, vector<1x64xf32>
    %113 = vector.broadcast %112 : vector<1x64xf32> to vector<4x64xf32>
    %114 = arith.addf %111, %113 : vector<4x64xf32>
    %115 = arith.mulf %114, %114 : vector<4x64xf32>
    %116 = arith.mulf %114, %115 : vector<4x64xf32>
    %cst_44 = arith.constant 4.471500e-02 : f32
    %117 = vector.broadcast %cst_44 : f32 to vector<4x64xf32>
    %118 = arith.mulf %117, %116 : vector<4x64xf32>
    %119 = arith.addf %114, %118 : vector<4x64xf32>
    %cst_45 = arith.constant 0.797884583 : f32
    %120 = vector.broadcast %cst_45 : f32 to vector<4x64xf32>
    %121 = arith.mulf %120, %119 : vector<4x64xf32>
    %122 = math.tanh %121 : vector<4x64xf32>
    %cst_46 = arith.constant 1.000000e+00 : f32
    %123 = vector.broadcast %cst_46 : f32 to vector<4x64xf32>
    %124 = arith.addf %123, %122 : vector<4x64xf32>
    %cst_47 = arith.constant 5.000000e-01 : f32
    %125 = vector.broadcast %cst_47 : f32 to vector<4x64xf32>
    %126 = arith.mulf %125, %124 : vector<4x64xf32>
    %127 = arith.mulf %114, %126 : vector<4x64xf32>
    %128 = arith.truncf %127 : vector<4x64xf32> to vector<4x64xbf16>
    %c0_48 = arith.constant 0 : index
    %c0_49 = arith.constant 0 : index
    %129 = vector.load %arg12[%c0_48, %c0_49] : memref<64x32xbf16, #tpu.memory_space<vmem>>, vector<64x32xbf16>
    %cst_50 = arith.constant dense<0.000000e+00> : vector<4x32xf32>
    %130 = tpu.matmul %128, %129, %cst_50 {dimension_numbers = #tpu.dot_dimension_numbers<[1], [0], [0], [1], [0, 0, 1, 1], [], []>} : vector<4x64xbf16>, vector<64x32xbf16>, vector<4x32xf32> -> vector<4x32xf32>
    %c0_51 = arith.constant 0 : index
    %c0_52 = arith.constant 0 : index
    %131 = vector.load %arg13[%c0_51, %c0_52] : memref<1x32xf32, #tpu.memory_space<vmem>>, vector<1x32xf32>
    %132 = vector.broadcast %131 : vector<1x32xf32> to vector<4x32xf32>
    %133 = arith.addf %130, %132 : vector<4x32xf32>
    %134 = arith.addf %84, %133 : vector<4x32xf32>
    %135 = vector.shape_cast %134 : vector<4x32xf32> to vector<1x4x32xf32>
    %136 = arith.truncf %135 : vector<1x4x32xf32> to vector<1x4x32xbf16>
    %c0_53 = arith.constant 0 : index
    %c0_54 = arith.constant 0 : index
    %c0_55 = arith.constant 0 : index
    %137 = vector.load %arg14[%c0_53, %c0_54, %c0_55] : memref<1x4x32xbf16, #tpu.memory_space<vmem>>, vector<1x4x32xbf16>
    tpu.vector_store %arg14[%c0_53, %c0_54, %c0_55], %136 {strides = array<i32>} : memref<1x4x32xbf16, #tpu.memory_space<vmem>>, vector<1x4x32xbf16>,
    return
  }
  func.func @transform_0(%arg0: i32) -> (i32, i32, i32) {
    %c0_i32 = arith.constant 0 : i32
    %c0_i32_0 = arith.constant 0 : i32
    %c0_i32_1 = arith.constant 0 : i32
    return %arg0, %c0_i32, %c0_i32_0 : i32, i32, i32
  }
  func.func @transform_1(%arg0: i32) -> (i32, i32) {
    %c0_i32 = arith.constant 0 : i32
    %c0_i32_0 = arith.constant 0 : i32
    %c0_i32_1 = arith.constant 0 : i32
    return %c0_i32, %c0_i32_0 : i32, i32
  }
  func.func @transform_2(%arg0: i32) -> (i32, i32) {
    %c0_i32 = arith.constant 0 : i32
    %c0_i32_0 = arith.constant 0 : i32
    %c0_i32_1 = arith.constant 0 : i32
    return %c0_i32, %c0_i32_0 : i32, i32
  }
  func.func @transform_3(%arg0: i32) -> (i32, i32) {
    %c0_i32 = arith.constant 0 : i32
    %c0_i32_0 = arith.constant 0 : i32
    %c0_i32_1 = arith.constant 0 : i32
    return %c0_i32, %c0_i32_0 : i32, i32
  }
  func.func @transform_4(%arg0: i32) -> (i32, i32) {
    %c0_i32 = arith.constant 0 : i32
    %c0_i32_0 = arith.constant 0 : i32
    %c0_i32_1 = arith.constant 0 : i32
    return %c0_i32, %c0_i32_0 : i32, i32
  }
  func.func @transform_5(%arg0: i32) -> (i32, i32) {
    %c0_i32 = arith.constant 0 : i32
    %c0_i32_0 = arith.constant 0 : i32
    %c0_i32_1 = arith.constant 0 : i32
    return %c0_i32, %c0_i32_0 : i32, i32
  }
  func.func @transform_6(%arg0: i32) -> (i32, i32) {
    %c0_i32 = arith.constant 0 : i32
    %c0_i32_0 = arith.constant 0 : i32
    %c0_i32_1 = arith.constant 0 : i32
    return %c0_i32, %c0_i32_0 : i32, i32
  }
  func.func @transform_7(%arg0: i32) -> (i32, i32) {
    %c0_i32 = arith.constant 0 : i32
    %c0_i32_0 = arith.constant 0 : i32
    %c0_i32_1 = arith.constant 0 : i32
    return %c0_i32, %c0_i32_0 : i32, i32
  }
  func.func @transform_8(%arg0: i32) -> (i32, i32) {
    %c0_i32 = arith.constant 0 : i32
    %c0_i32_0 = arith.constant 0 : i32
    %c0_i32_1 = arith.constant 0 : i32
    return %c0_i32, %c0_i32_0 : i32, i32
  }
  func.func @transform_9(%arg0: i32) -> (i32, i32) {
    %c0_i32 = arith.constant 0 : i32
    %c0_i32_0 = arith.constant 0 : i32
    %c0_i32_1 = arith.constant 0 : i32
    return %c0_i32, %c0_i32_0 : i32, i32
  }
  func.func @transform_10(%arg0: i32) -> (i32, i32) {
    %c0_i32 = arith.constant 0 : i32
    %c0_i32_0 = arith.constant 0 : i32
    %c0_i32_1 = arith.constant 0 : i32
    return %c0_i32, %c0_i32_0 : i32, i32
  }
  func.func @transform_11(%arg0: i32) -> (i32, i32) {
    %c0_i32 = arith.constant 0 : i32
    %c0_i32_0 = arith.constant 0 : i32
    %c0_i32_1 = arith.constant 0 : i32
    return %c0_i32, %c0_i32_0 : i32, i32
  }
  func.func @transform_12(%arg0: i32) -> (i32, i32) {
    %c0_i32 = arith.constant 0 : i32
    %c0_i32_0 = arith.constant 0 : i32
    %c0_i32_1 = arith.constant 0 : i32
    return %c0_i32, %c0_i32_0 : i32, i32
  }
  func.func @transform_13(%arg0: i32) -> (i32, i32, i32) {
    %c0_i32 = arith.constant 0 : i32
    %c0_i32_0 = arith.constant 0 : i32
    %c0_i32_1 = arith.constant 0 : i32
    return %arg0, %c0_i32, %c0_i32_0 : i32, i32, i32
  }
}

module attributes {stable_mosaic.version = 11 : i64} {
  func.func @_fused_layer_kernel(%arg0: i32, %arg1: memref<1x8x32xbf16, #tpu.memory_space<vmem>>, %arg2: memref<1x1x8xf32, #tpu.memory_space<vmem>>, %arg3: memref<1x32xf32, #tpu.memory_space<vmem>>, %arg4: memref<1x32xf32, #tpu.memory_space<vmem>>, %arg5: memref<32x96xbf16, #tpu.memory_space<vmem>>, %arg6: memref<1x96xf32, #tpu.memory_space<vmem>>, %arg7: memref<32x32xbf16, #tpu.memory_space<vmem>>, %arg8: memref<1x32xf32, #tpu.memory_space<vmem>>, %arg9: memref<1x32xf32, #tpu.memory_space<vmem>>, %arg10: memref<1x32xf32, #tpu.memory_space<vmem>>, %arg11: memref<32x64xbf16, #tpu.memory_space<vmem>>, %arg12: memref<1x64xf32, #tpu.memory_space<vmem>>, %arg13: memref<64x32xbf16, #tpu.memory_space<vmem>>, %arg14: memref<1x32xf32, #tpu.memory_space<vmem>>, %arg15: memref<1x8x32xbf16, #tpu.memory_space<vmem>>) attributes {dimension_semantics = [#tpu.dimension_semantics<parallel>], iteration_bounds = array<i64: 2>, scalar_prefetch = 0 : i64, scratch_operands = 0 : i64, tpu.core_type = #tpu.core_type<tc>, window_params = [{transform_indices = @transform_0, window_bounds = array<i64: 1, 8, 32>}, {transform_indices = @transform_1, window_bounds = array<i64: 1, 1, 8>}, {pipeline_mode = #tpu.pipeline_mode<synchronous>, transform_indices = @transform_2, window_bounds = array<i64: 1, 32>}, {pipeline_mode = #tpu.pipeline_mode<synchronous>, transform_indices = @transform_3, window_bounds = array<i64: 1, 32>}, {pipeline_mode = #tpu.pipeline_mode<synchronous>, transform_indices = @transform_4, window_bounds = array<i64: 32, 96>}, {pipeline_mode = #tpu.pipeline_mode<synchronous>, transform_indices = @transform_5, window_bounds = array<i64: 1, 96>}, {pipeline_mode = #tpu.pipeline_mode<synchronous>, transform_indices = @transform_6, window_bounds = array<i64: 32, 32>}, {pipeline_mode = #tpu.pipeline_mode<synchronous>, transform_indices = @transform_7, window_bounds = array<i64: 1, 32>}, {pipeline_mode = #tpu.pipeline_mode<synchronous>, transform_indices = @transform_8, window_bounds = array<i64: 1, 32>}, {pipeline_mode = #tpu.pipeline_mode<synchronous>, transform_indices = @transform_9, window_bounds = array<i64: 1, 32>}, {pipeline_mode = #tpu.pipeline_mode<synchronous>, transform_indices = @transform_10, window_bounds = array<i64: 32, 64>}, {pipeline_mode = #tpu.pipeline_mode<synchronous>, transform_indices = @transform_11, window_bounds = array<i64: 1, 64>}, {pipeline_mode = #tpu.pipeline_mode<synchronous>, transform_indices = @transform_12, window_bounds = array<i64: 64, 32>}, {pipeline_mode = #tpu.pipeline_mode<synchronous>, transform_indices = @transform_13, window_bounds = array<i64: 1, 32>}, {transform_indices = @transform_14, window_bounds = array<i64: 1, 8, 32>}]} {
    %c0 = arith.constant 0 : index
    %c0_0 = arith.constant 0 : index
    %c0_1 = arith.constant 0 : index
    %0 = vector.load %arg1[%c0, %c0_0, %c0_1] : memref<1x8x32xbf16, #tpu.memory_space<vmem>>, vector<1x8x32xbf16>
    %1 = vector.shape_cast %0 : vector<1x8x32xbf16> to vector<8x32xbf16>
    %2 = arith.extf %1 : vector<8x32xbf16> to vector<8x32xf32>
    %c0_2 = arith.constant 0 : index
    %c0_3 = arith.constant 0 : index
    %3 = vector.load %arg3[%c0_2, %c0_3] : memref<1x32xf32, #tpu.memory_space<vmem>>, vector<1x32xf32>
    %c0_4 = arith.constant 0 : index
    %c0_5 = arith.constant 0 : index
    %4 = vector.load %arg4[%c0_4, %c0_5] : memref<1x32xf32, #tpu.memory_space<vmem>>, vector<1x32xf32>
    %cst = arith.constant dense<0.000000e+00> : vector<8xf32>
    %5 = vector.multi_reduction <add>, %2, %cst [1] : vector<8x32xf32> to vector<8xf32>
    %6 = vector.shape_cast %5 : vector<8xf32> to vector<8x1xf32>
    %cst_6 = arith.constant 3.200000e+01 : f32
    %7 = vector.broadcast %cst_6 : f32 to vector<8x1xf32>
    %8 = arith.divf %6, %7 : vector<8x1xf32>
    %9 = vector.broadcast %8 : vector<8x1xf32> to vector<8x32xf32>
    %10 = arith.subf %2, %9 : vector<8x32xf32>
    %11 = arith.mulf %10, %10 : vector<8x32xf32>
    %cst_7 = arith.constant dense<0.000000e+00> : vector<8xf32>
    %12 = vector.multi_reduction <add>, %11, %cst_7 [1] : vector<8x32xf32> to vector<8xf32>
    %13 = vector.shape_cast %12 : vector<8xf32> to vector<8x1xf32>
    %cst_8 = arith.constant 3.200000e+01 : f32
    %14 = vector.broadcast %cst_8 : f32 to vector<8x1xf32>
    %15 = arith.divf %13, %14 : vector<8x1xf32>
    %16 = vector.broadcast %8 : vector<8x1xf32> to vector<8x32xf32>
    %17 = arith.subf %2, %16 : vector<8x32xf32>
    %cst_9 = arith.constant 9.99999997E-7 : f32
    %18 = vector.broadcast %cst_9 : f32 to vector<8x1xf32>
    %19 = arith.addf %15, %18 : vector<8x1xf32>
    %20 = math.rsqrt %19 : vector<8x1xf32>
    %21 = vector.broadcast %20 : vector<8x1xf32> to vector<8x32xf32>
    %22 = arith.mulf %17, %21 : vector<8x32xf32>
    %23 = vector.broadcast %3 : vector<1x32xf32> to vector<8x32xf32>
    %24 = arith.mulf %22, %23 : vector<8x32xf32>
    %25 = vector.broadcast %4 : vector<1x32xf32> to vector<8x32xf32>
    %26 = arith.addf %24, %25 : vector<8x32xf32>
    %27 = arith.truncf %26 : vector<8x32xf32> to vector<8x32xbf16>
    %c0_10 = arith.constant 0 : index
    %c0_11 = arith.constant 0 : index
    %28 = vector.load %arg5[%c0_10, %c0_11] : memref<32x96xbf16, #tpu.memory_space<vmem>>, vector<32x96xbf16>
    %cst_12 = arith.constant dense<0.000000e+00> : vector<8x96xf32>
    %29 = tpu.matmul %27, %28, %cst_12 {dimension_numbers = #tpu.dot_dimension_numbers<[1], [0], [0], [1], [0, 0, 1, 1], [], []>} : vector<8x32xbf16>, vector<32x96xbf16>, vector<8x96xf32> -> vector<8x96xf32>
    %c0_13 = arith.constant 0 : index
    %c0_14 = arith.constant 0 : index
    %30 = vector.load %arg6[%c0_13, %c0_14] : memref<1x96xf32, #tpu.memory_space<vmem>>, vector<1x96xf32>
    %31 = vector.broadcast %30 : vector<1x96xf32> to vector<8x96xf32>
    %32 = arith.addf %29, %31 : vector<8x96xf32>
    %c0_15 = arith.constant 0 : index
    %c0_16 = arith.constant 0 : index
    %c0_17 = arith.constant 0 : index
    %33 = vector.load %arg2[%c0_15, %c0_16, %c0_17] : memref<1x1x8xf32, #tpu.memory_space<vmem>>, vector<1x1x8xf32>
    %34 = vector.shape_cast %33 : vector<1x1x8xf32> to vector<1x8xf32>
    %35 = vector.shape_cast %34 : vector<1x8xf32> to vector<1x8xf32>
    %36 = vector.broadcast %35 : vector<1x8xf32> to vector<8x8xf32>
    %c0_18 = arith.constant 0 : index
    %c0_19 = arith.constant 0 : index
    %37 = vector.load %arg7[%c0_18, %c0_19] : memref<32x32xbf16, #tpu.memory_space<vmem>>, vector<32x32xbf16>
    %cst_20 = arith.constant 0.000000e+00 : f32
    %38 = vector.broadcast %cst_20 : f32 to vector<8x32xf32>
    %39 = vector.extract_strided_slice %32 {offsets = [0, 0], sizes = [8, 16], strides = [1, 1]} : vector<8x96xf32> to vector<8x16xf32>
    %40 = arith.truncf %39 : vector<8x16xf32> to vector<8x16xbf16>
    %41 = vector.extract_strided_slice %32 {offsets = [0, 32], sizes = [8, 16], strides = [1, 1]} : vector<8x96xf32> to vector<8x16xf32>
    %42 = arith.truncf %41 : vector<8x16xf32> to vector<8x16xbf16>
    %43 = vector.extract_strided_slice %32 {offsets = [0, 64], sizes = [8, 16], strides = [1, 1]} : vector<8x96xf32> to vector<8x16xf32>
    %44 = arith.truncf %43 : vector<8x16xf32> to vector<8x16xbf16>
    %cst_21 = arith.constant dense<0.000000e+00> : vector<8x8xf32>
    %45 = tpu.matmul %40, %42, %cst_21 {dimension_numbers = #tpu.dot_dimension_numbers<[1], [1], [0], [0], [0, 0, 1, 0], [], []>} : vector<8x16xbf16>, vector<8x16xbf16>, vector<8x8xf32> -> vector<8x8xf32>
    %46 = arith.addf %45, %36 : vector<8x8xf32>
    %cst_22 = arith.constant dense<0xFF800000> : vector<8xf32>
    %47 = vector.multi_reduction <maximumf>, %46, %cst_22 [1] : vector<8x8xf32> to vector<8xf32>
    %48 = vector.shape_cast %47 : vector<8xf32> to vector<8x1xf32>
    %49 = vector.broadcast %48 : vector<8x1xf32> to vector<8x8xf32>
    %50 = arith.subf %46, %49 : vector<8x8xf32>
    %51 = math.exp %50 : vector<8x8xf32>
    %cst_23 = arith.constant dense<0.000000e+00> : vector<8xf32>
    %52 = vector.multi_reduction <add>, %51, %cst_23 [1] : vector<8x8xf32> to vector<8xf32>
    %53 = vector.shape_cast %52 : vector<8xf32> to vector<8x1xf32>
    %54 = tpu.reciprocal %53 {approx = true} : vector<8x1xf32> -> vector<8x1xf32>
    %55 = vector.broadcast %54 : vector<8x1xf32> to vector<8x8xf32>
    %56 = arith.mulf %51, %55 : vector<8x8xf32>
    %57 = arith.truncf %56 : vector<8x8xf32> to vector<8x8xbf16>
    %cst_24 = arith.constant dense<0.000000e+00> : vector<8x16xf32>
    %58 = tpu.matmul %57, %44, %cst_24 {dimension_numbers = #tpu.dot_dimension_numbers<[1], [0], [0], [1], [0, 0, 1, 1], [], []>} : vector<8x8xbf16>, vector<8x16xbf16>, vector<8x16xf32> -> vector<8x16xf32>
    %59 = arith.truncf %58 : vector<8x16xf32> to vector<8x16xbf16>
    %60 = vector.extract_strided_slice %37 {offsets = [0, 0], sizes = [16, 32], strides = [1, 1]} : vector<32x32xbf16> to vector<16x32xbf16>
    %cst_25 = arith.constant dense<0.000000e+00> : vector<8x32xf32>
    %61 = tpu.matmul %59, %60, %cst_25 {dimension_numbers = #tpu.dot_dimension_numbers<[1], [0], [0], [1], [0, 0, 1, 1], [], []>} : vector<8x16xbf16>, vector<16x32xbf16>, vector<8x32xf32> -> vector<8x32xf32>
    %62 = arith.addf %38, %61 : vector<8x32xf32>
    %63 = vector.extract_strided_slice %32 {offsets = [0, 16], sizes = [8, 16], strides = [1, 1]} : vector<8x96xf32> to vector<8x16xf32>
    %64 = arith.truncf %63 : vector<8x16xf32> to vector<8x16xbf16>
    %65 = vector.extract_strided_slice %32 {offsets = [0, 48], sizes = [8, 16], strides = [1, 1]} : vector<8x96xf32> to vector<8x16xf32>
    %66 = arith.truncf %65 : vector<8x16xf32> to vector<8x16xbf16>
    %67 = vector.extract_strided_slice %32 {offsets = [0, 80], sizes = [8, 16], strides = [1, 1]} : vector<8x96xf32> to vector<8x16xf32>
    %68 = arith.truncf %67 : vector<8x16xf32> to vector<8x16xbf16>
    %cst_26 = arith.constant dense<0.000000e+00> : vector<8x8xf32>
    %69 = tpu.matmul %64, %66, %cst_26 {dimension_numbers = #tpu.dot_dimension_numbers<[1], [1], [0], [0], [0, 0, 1, 0], [], []>} : vector<8x16xbf16>, vector<8x16xbf16>, vector<8x8xf32> -> vector<8x8xf32>
    %70 = arith.addf %69, %36 : vector<8x8xf32>
    %cst_27 = arith.constant dense<0xFF800000> : vector<8xf32>
    %71 = vector.multi_reduction <maximumf>, %70, %cst_27 [1] : vector<8x8xf32> to vector<8xf32>
    %72 = vector.shape_cast %71 : vector<8xf32> to vector<8x1xf32>
    %73 = vector.broadcast %72 : vector<8x1xf32> to vector<8x8xf32>
    %74 = arith.subf %70, %73 : vector<8x8xf32>
    %75 = math.exp %74 : vector<8x8xf32>
    %cst_28 = arith.constant dense<0.000000e+00> : vector<8xf32>
    %76 = vector.multi_reduction <add>, %75, %cst_28 [1] : vector<8x8xf32> to vector<8xf32>
    %77 = vector.shape_cast %76 : vector<8xf32> to vector<8x1xf32>
    %78 = tpu.reciprocal %77 {approx = true} : vector<8x1xf32> -> vector<8x1xf32>
    %79 = vector.broadcast %78 : vector<8x1xf32> to vector<8x8xf32>
    %80 = arith.mulf %75, %79 : vector<8x8xf32>
    %81 = arith.truncf %80 : vector<8x8xf32> to vector<8x8xbf16>
    %cst_29 = arith.constant dense<0.000000e+00> : vector<8x16xf32>
    %82 = tpu.matmul %81, %68, %cst_29 {dimension_numbers = #tpu.dot_dimension_numbers<[1], [0], [0], [1], [0, 0, 1, 1], [], []>} : vector<8x8xbf16>, vector<8x16xbf16>, vector<8x16xf32> -> vector<8x16xf32>
    %83 = arith.truncf %82 : vector<8x16xf32> to vector<8x16xbf16>
    %84 = vector.extract_strided_slice %37 {offsets = [16, 0], sizes = [16, 32], strides = [1, 1]} : vector<32x32xbf16> to vector<16x32xbf16>
    %cst_30 = arith.constant dense<0.000000e+00> : vector<8x32xf32>
    %85 = tpu.matmul %83, %84, %cst_30 {dimension_numbers = #tpu.dot_dimension_numbers<[1], [0], [0], [1], [0, 0, 1, 1], [], []>} : vector<8x16xbf16>, vector<16x32xbf16>, vector<8x32xf32> -> vector<8x32xf32>
    %86 = arith.addf %62, %85 : vector<8x32xf32>
    %87 = arith.addf %2, %86 : vector<8x32xf32>
    %c0_31 = arith.constant 0 : index
    %c0_32 = arith.constant 0 : index
    %88 = vector.load %arg8[%c0_31, %c0_32] : memref<1x32xf32, #tpu.memory_space<vmem>>, vector<1x32xf32>
    %89 = vector.broadcast %88 : vector<1x32xf32> to vector<8x32xf32>
    %90 = arith.addf %87, %89 : vector<8x32xf32>
    %c0_33 = arith.constant 0 : index
    %c0_34 = arith.constant 0 : index
    %91 = vector.load %arg9[%c0_33, %c0_34] : memref<1x32xf32, #tpu.memory_space<vmem>>, vector<1x32xf32>
    %c0_35 = arith.constant 0 : index
    %c0_36 = arith.constant 0 : index
    %92 = vector.load %arg10[%c0_35, %c0_36] : memref<1x32xf32, #tpu.memory_space<vmem>>, vector<1x32xf32>
    %cst_37 = arith.constant dense<0.000000e+00> : vector<8xf32>
    %93 = vector.multi_reduction <add>, %90, %cst_37 [1] : vector<8x32xf32> to vector<8xf32>
    %94 = vector.shape_cast %93 : vector<8xf32> to vector<8x1xf32>
    %cst_38 = arith.constant 3.200000e+01 : f32
    %95 = vector.broadcast %cst_38 : f32 to vector<8x1xf32>
    %96 = arith.divf %94, %95 : vector<8x1xf32>
    %97 = vector.broadcast %96 : vector<8x1xf32> to vector<8x32xf32>
    %98 = arith.subf %90, %97 : vector<8x32xf32>
    %99 = arith.mulf %98, %98 : vector<8x32xf32>
    %cst_39 = arith.constant dense<0.000000e+00> : vector<8xf32>
    %100 = vector.multi_reduction <add>, %99, %cst_39 [1] : vector<8x32xf32> to vector<8xf32>
    %101 = vector.shape_cast %100 : vector<8xf32> to vector<8x1xf32>
    %cst_40 = arith.constant 3.200000e+01 : f32
    %102 = vector.broadcast %cst_40 : f32 to vector<8x1xf32>
    %103 = arith.divf %101, %102 : vector<8x1xf32>
    %104 = vector.broadcast %96 : vector<8x1xf32> to vector<8x32xf32>
    %105 = arith.subf %90, %104 : vector<8x32xf32>
    %cst_41 = arith.constant 9.99999997E-7 : f32
    %106 = vector.broadcast %cst_41 : f32 to vector<8x1xf32>
    %107 = arith.addf %103, %106 : vector<8x1xf32>
    %108 = math.rsqrt %107 : vector<8x1xf32>
    %109 = vector.broadcast %108 : vector<8x1xf32> to vector<8x32xf32>
    %110 = arith.mulf %105, %109 : vector<8x32xf32>
    %111 = vector.broadcast %91 : vector<1x32xf32> to vector<8x32xf32>
    %112 = arith.mulf %110, %111 : vector<8x32xf32>
    %113 = vector.broadcast %92 : vector<1x32xf32> to vector<8x32xf32>
    %114 = arith.addf %112, %113 : vector<8x32xf32>
    %115 = arith.truncf %114 : vector<8x32xf32> to vector<8x32xbf16>
    %c0_42 = arith.constant 0 : index
    %c0_43 = arith.constant 0 : index
    %116 = vector.load %arg11[%c0_42, %c0_43] : memref<32x64xbf16, #tpu.memory_space<vmem>>, vector<32x64xbf16>
    %cst_44 = arith.constant dense<0.000000e+00> : vector<8x64xf32>
    %117 = tpu.matmul %115, %116, %cst_44 {dimension_numbers = #tpu.dot_dimension_numbers<[1], [0], [0], [1], [0, 0, 1, 1], [], []>} : vector<8x32xbf16>, vector<32x64xbf16>, vector<8x64xf32> -> vector<8x64xf32>
    %c0_45 = arith.constant 0 : index
    %c0_46 = arith.constant 0 : index
    %118 = vector.load %arg12[%c0_45, %c0_46] : memref<1x64xf32, #tpu.memory_space<vmem>>, vector<1x64xf32>
    %119 = vector.broadcast %118 : vector<1x64xf32> to vector<8x64xf32>
    %120 = arith.addf %117, %119 : vector<8x64xf32>
    %121 = arith.mulf %120, %120 : vector<8x64xf32>
    %122 = arith.mulf %120, %121 : vector<8x64xf32>
    %cst_47 = arith.constant 4.471500e-02 : f32
    %123 = vector.broadcast %cst_47 : f32 to vector<8x64xf32>
    %124 = arith.mulf %123, %122 : vector<8x64xf32>
    %125 = arith.addf %120, %124 : vector<8x64xf32>
    %cst_48 = arith.constant 0.797884583 : f32
    %126 = vector.broadcast %cst_48 : f32 to vector<8x64xf32>
    %127 = arith.mulf %126, %125 : vector<8x64xf32>
    %128 = math.tanh %127 : vector<8x64xf32>
    %cst_49 = arith.constant 1.000000e+00 : f32
    %129 = vector.broadcast %cst_49 : f32 to vector<8x64xf32>
    %130 = arith.addf %129, %128 : vector<8x64xf32>
    %cst_50 = arith.constant 5.000000e-01 : f32
    %131 = vector.broadcast %cst_50 : f32 to vector<8x64xf32>
    %132 = arith.mulf %131, %130 : vector<8x64xf32>
    %133 = arith.mulf %120, %132 : vector<8x64xf32>
    %134 = arith.truncf %133 : vector<8x64xf32> to vector<8x64xbf16>
    %c0_51 = arith.constant 0 : index
    %c0_52 = arith.constant 0 : index
    %135 = vector.load %arg13[%c0_51, %c0_52] : memref<64x32xbf16, #tpu.memory_space<vmem>>, vector<64x32xbf16>
    %cst_53 = arith.constant dense<0.000000e+00> : vector<8x32xf32>
    %136 = tpu.matmul %134, %135, %cst_53 {dimension_numbers = #tpu.dot_dimension_numbers<[1], [0], [0], [1], [0, 0, 1, 1], [], []>} : vector<8x64xbf16>, vector<64x32xbf16>, vector<8x32xf32> -> vector<8x32xf32>
    %c0_54 = arith.constant 0 : index
    %c0_55 = arith.constant 0 : index
    %137 = vector.load %arg14[%c0_54, %c0_55] : memref<1x32xf32, #tpu.memory_space<vmem>>, vector<1x32xf32>
    %138 = vector.broadcast %137 : vector<1x32xf32> to vector<8x32xf32>
    %139 = arith.addf %136, %138 : vector<8x32xf32>
    %140 = arith.addf %90, %139 : vector<8x32xf32>
    %141 = vector.shape_cast %140 : vector<8x32xf32> to vector<1x8x32xf32>
    %142 = arith.truncf %141 : vector<1x8x32xf32> to vector<1x8x32xbf16>
    %c0_56 = arith.constant 0 : index
    %c0_57 = arith.constant 0 : index
    %c0_58 = arith.constant 0 : index
    %143 = vector.load %arg15[%c0_56, %c0_57, %c0_58] : memref<1x8x32xbf16, #tpu.memory_space<vmem>>, vector<1x8x32xbf16>
    tpu.vector_store %arg15[%c0_56, %c0_57, %c0_58], %142 {strides = array<i32>} : memref<1x8x32xbf16, #tpu.memory_space<vmem>>, vector<1x8x32xbf16>,
    return
  }
  func.func @transform_0(%arg0: i32) -> (i32, i32, i32) {
    %c0_i32 = arith.constant 0 : i32
    %c0_i32_0 = arith.constant 0 : i32
    %c0_i32_1 = arith.constant 0 : i32
    return %arg0, %c0_i32, %c0_i32_0 : i32, i32, i32
  }
  func.func @transform_1(%arg0: i32) -> (i32, i32, i32) {
    %c0_i32 = arith.constant 0 : i32
    %c0_i32_0 = arith.constant 0 : i32
    %c0_i32_1 = arith.constant 0 : i32
    return %arg0, %c0_i32, %c0_i32_0 : i32, i32, i32
  }
  func.func @transform_2(%arg0: i32) -> (i32, i32) {
    %c0_i32 = arith.constant 0 : i32
    %c0_i32_0 = arith.constant 0 : i32
    %c0_i32_1 = arith.constant 0 : i32
    return %c0_i32, %c0_i32_0 : i32, i32
  }
  func.func @transform_3(%arg0: i32) -> (i32, i32) {
    %c0_i32 = arith.constant 0 : i32
    %c0_i32_0 = arith.constant 0 : i32
    %c0_i32_1 = arith.constant 0 : i32
    return %c0_i32, %c0_i32_0 : i32, i32
  }
  func.func @transform_4(%arg0: i32) -> (i32, i32) {
    %c0_i32 = arith.constant 0 : i32
    %c0_i32_0 = arith.constant 0 : i32
    %c0_i32_1 = arith.constant 0 : i32
    return %c0_i32, %c0_i32_0 : i32, i32
  }
  func.func @transform_5(%arg0: i32) -> (i32, i32) {
    %c0_i32 = arith.constant 0 : i32
    %c0_i32_0 = arith.constant 0 : i32
    %c0_i32_1 = arith.constant 0 : i32
    return %c0_i32, %c0_i32_0 : i32, i32
  }
  func.func @transform_6(%arg0: i32) -> (i32, i32) {
    %c0_i32 = arith.constant 0 : i32
    %c0_i32_0 = arith.constant 0 : i32
    %c0_i32_1 = arith.constant 0 : i32
    return %c0_i32, %c0_i32_0 : i32, i32
  }
  func.func @transform_7(%arg0: i32) -> (i32, i32) {
    %c0_i32 = arith.constant 0 : i32
    %c0_i32_0 = arith.constant 0 : i32
    %c0_i32_1 = arith.constant 0 : i32
    return %c0_i32, %c0_i32_0 : i32, i32
  }
  func.func @transform_8(%arg0: i32) -> (i32, i32) {
    %c0_i32 = arith.constant 0 : i32
    %c0_i32_0 = arith.constant 0 : i32
    %c0_i32_1 = arith.constant 0 : i32
    return %c0_i32, %c0_i32_0 : i32, i32
  }
  func.func @transform_9(%arg0: i32) -> (i32, i32) {
    %c0_i32 = arith.constant 0 : i32
    %c0_i32_0 = arith.constant 0 : i32
    %c0_i32_1 = arith.constant 0 : i32
    return %c0_i32, %c0_i32_0 : i32, i32
  }
  func.func @transform_10(%arg0: i32) -> (i32, i32) {
    %c0_i32 = arith.constant 0 : i32
    %c0_i32_0 = arith.constant 0 : i32
    %c0_i32_1 = arith.constant 0 : i32
    return %c0_i32, %c0_i32_0 : i32, i32
  }
  func.func @transform_11(%arg0: i32) -> (i32, i32) {
    %c0_i32 = arith.constant 0 : i32
    %c0_i32_0 = arith.constant 0 : i32
    %c0_i32_1 = arith.constant 0 : i32
    return %c0_i32, %c0_i32_0 : i32, i32
  }
  func.func @transform_12(%arg0: i32) -> (i32, i32) {
    %c0_i32 = arith.constant 0 : i32
    %c0_i32_0 = arith.constant 0 : i32
    %c0_i32_1 = arith.constant 0 : i32
    return %c0_i32, %c0_i32_0 : i32, i32
  }
  func.func @transform_13(%arg0: i32) -> (i32, i32) {
    %c0_i32 = arith.constant 0 : i32
    %c0_i32_0 = arith.constant 0 : i32
    %c0_i32_1 = arith.constant 0 : i32
    return %c0_i32, %c0_i32_0 : i32, i32
  }
  func.func @transform_14(%arg0: i32) -> (i32, i32, i32) {
    %c0_i32 = arith.constant 0 : i32
    %c0_i32_0 = arith.constant 0 : i32
    %c0_i32_1 = arith.constant 0 : i32
    return %arg0, %c0_i32, %c0_i32_0 : i32, i32, i32
  }
}

module attributes {stable_mosaic.version = 11 : i64} {
  func.func @_head_loss_kernel(%arg0: memref<2x4x32xbf16, #tpu.memory_space<vmem>>, %arg1: memref<2x8x32xbf16, #tpu.memory_space<vmem>>, %arg2: memref<2x8xf32, #tpu.memory_space<vmem>>, %arg3: memref<1x32xf32, #tpu.memory_space<vmem>>, %arg4: memref<1x32xf32, #tpu.memory_space<vmem>>, %arg5: memref<1x32xf32, #tpu.memory_space<vmem>>, %arg6: memref<1x32xf32, #tpu.memory_space<vmem>>, %arg7: memref<32x128xbf16, #tpu.memory_space<vmem>>, %arg8: memref<1x128xf32, #tpu.memory_space<vmem>>, %arg9: memref<32x32xbf16, #tpu.memory_space<vmem>>, %arg10: memref<1x32xf32, #tpu.memory_space<vmem>>, %arg11: memref<32x32xbf16, #tpu.memory_space<vmem>>, %arg12: memref<1x32xf32, #tpu.memory_space<vmem>>, %arg13: memref<1x1xf32, #tpu.memory_space<smem>>, %arg14: memref<1x1xf32, #tpu.memory_space<smem>>, %arg15: memref<2x128xf32, #tpu.memory_space<vmem>>, %arg16: memref<1x1xf32, #tpu.memory_space<smem>>) attributes {dimension_semantics = [], scalar_prefetch = 0 : i64, scratch_operands = 0 : i64, tpu.core_type = #tpu.core_type<tc>} {
    %c0 = arith.constant 0 : index
    %c0_0 = arith.constant 0 : index
    %c0_1 = arith.constant 0 : index
    %0 = vector.load %arg0[%c0, %c0_0, %c0_1] : memref<2x4x32xbf16, #tpu.memory_space<vmem>>, vector<2x4x32xbf16>
    %1 = arith.extf %0 : vector<2x4x32xbf16> to vector<2x4x32xf32>
    %2 = vector.shape_cast %1 : vector<2x4x32xf32> to vector<8x32xf32>
    %c0_2 = arith.constant 0 : index
    %c0_3 = arith.constant 0 : index
    %3 = vector.load %arg3[%c0_2, %c0_3] : memref<1x32xf32, #tpu.memory_space<vmem>>, vector<1x32xf32>
    %c0_4 = arith.constant 0 : index
    %c0_5 = arith.constant 0 : index
    %4 = vector.load %arg4[%c0_4, %c0_5] : memref<1x32xf32, #tpu.memory_space<vmem>>, vector<1x32xf32>
    %cst = arith.constant dense<0.000000e+00> : vector<8xf32>
    %5 = vector.multi_reduction <add>, %2, %cst [1] : vector<8x32xf32> to vector<8xf32>
    %6 = vector.shape_cast %5 : vector<8xf32> to vector<8x1xf32>
    %cst_6 = arith.constant 3.200000e+01 : f32
    %7 = vector.broadcast %cst_6 : f32 to vector<8x1xf32>
    %8 = arith.divf %6, %7 : vector<8x1xf32>
    %9 = vector.broadcast %8 : vector<8x1xf32> to vector<8x32xf32>
    %10 = arith.subf %2, %9 : vector<8x32xf32>
    %11 = arith.mulf %10, %10 : vector<8x32xf32>
    %cst_7 = arith.constant dense<0.000000e+00> : vector<8xf32>
    %12 = vector.multi_reduction <add>, %11, %cst_7 [1] : vector<8x32xf32> to vector<8xf32>
    %13 = vector.shape_cast %12 : vector<8xf32> to vector<8x1xf32>
    %cst_8 = arith.constant 3.200000e+01 : f32
    %14 = vector.broadcast %cst_8 : f32 to vector<8x1xf32>
    %15 = arith.divf %13, %14 : vector<8x1xf32>
    %16 = vector.broadcast %8 : vector<8x1xf32> to vector<8x32xf32>
    %17 = arith.subf %2, %16 : vector<8x32xf32>
    %cst_9 = arith.constant 9.99999997E-7 : f32
    %18 = vector.broadcast %cst_9 : f32 to vector<8x1xf32>
    %19 = arith.addf %15, %18 : vector<8x1xf32>
    %20 = math.rsqrt %19 : vector<8x1xf32>
    %21 = vector.broadcast %20 : vector<8x1xf32> to vector<8x32xf32>
    %22 = arith.mulf %17, %21 : vector<8x32xf32>
    %23 = vector.broadcast %3 : vector<1x32xf32> to vector<8x32xf32>
    %24 = arith.mulf %22, %23 : vector<8x32xf32>
    %25 = vector.broadcast %4 : vector<1x32xf32> to vector<8x32xf32>
    %26 = arith.addf %24, %25 : vector<8x32xf32>
    %27 = vector.shape_cast %26 : vector<8x32xf32> to vector<2x4x32xf32>
    %28 = vector.extract_strided_slice %27 {offsets = [0, 0, 0], sizes = [2, 1, 32], strides = [1, 1, 1]} : vector<2x4x32xf32> to vector<2x1x32xf32>
    %29 = vector.shape_cast %28 : vector<2x1x32xf32> to vector<2x32xf32>
    %30 = arith.truncf %29 : vector<2x32xf32> to vector<2x32xbf16>
    %c0_10 = arith.constant 0 : index
    %c0_11 = arith.constant 0 : index
    %31 = vector.load %arg7[%c0_10, %c0_11] : memref<32x128xbf16, #tpu.memory_space<vmem>>, vector<32x128xbf16>
    %cst_12 = arith.constant dense<0.000000e+00> : vector<2x128xf32>
    %32 = tpu.matmul %30, %31, %cst_12 {dimension_numbers = #tpu.dot_dimension_numbers<[1], [0], [0], [1], [0, 0, 1, 1], [], []>} : vector<2x32xbf16>, vector<32x128xbf16>, vector<2x128xf32> -> vector<2x128xf32>
    %c0_13 = arith.constant 0 : index
    %c0_14 = arith.constant 0 : index
    %33 = vector.load %arg8[%c0_13, %c0_14] : memref<1x128xf32, #tpu.memory_space<vmem>>, vector<1x128xf32>
    %34 = vector.broadcast %33 : vector<1x128xf32> to vector<2x128xf32>
    %35 = arith.addf %32, %34 : vector<2x128xf32>
    %c0_15 = arith.constant 0 : index
    %c0_16 = arith.constant 0 : index
    %36 = vector.load %arg15[%c0_15, %c0_16] : memref<2x128xf32, #tpu.memory_space<vmem>>, vector<2x128xf32>
    tpu.vector_store %arg15[%c0_15, %c0_16], %35 {strides = array<i32>} : memref<2x128xf32, #tpu.memory_space<vmem>>, vector<2x128xf32>,
    %cst_17 = arith.constant dense<0.000000e+00> : vector<2x32xf32>
    %37 = vector.multi_reduction <add>, %27, %cst_17 [1] : vector<2x4x32xf32> to vector<2x32xf32>
    %cst_18 = arith.constant 4.000000e+00 : f32
    %38 = vector.broadcast %cst_18 : f32 to vector<2x32xf32>
    %39 = arith.divf %37, %38 : vector<2x32xf32>
    %c0_19 = arith.constant 0 : index
    %c0_20 = arith.constant 0 : index
    %c0_21 = arith.constant 0 : index
    %40 = vector.load %arg1[%c0_19, %c0_20, %c0_21] : memref<2x8x32xbf16, #tpu.memory_space<vmem>>, vector<2x8x32xbf16>
    %41 = arith.extf %40 : vector<2x8x32xbf16> to vector<2x8x32xf32>
    %42 = vector.shape_cast %41 : vector<2x8x32xf32> to vector<16x32xf32>
    %c0_22 = arith.constant 0 : index
    %c0_23 = arith.constant 0 : index
    %43 = vector.load %arg5[%c0_22, %c0_23] : memref<1x32xf32, #tpu.memory_space<vmem>>, vector<1x32xf32>
    %c0_24 = arith.constant 0 : index
    %c0_25 = arith.constant 0 : index
    %44 = vector.load %arg6[%c0_24, %c0_25] : memref<1x32xf32, #tpu.memory_space<vmem>>, vector<1x32xf32>
    %cst_26 = arith.constant dense<0.000000e+00> : vector<16xf32>
    %45 = vector.multi_reduction <add>, %42, %cst_26 [1] : vector<16x32xf32> to vector<16xf32>
    %46 = vector.shape_cast %45 : vector<16xf32> to vector<16x1xf32>
    %cst_27 = arith.constant 3.200000e+01 : f32
    %47 = vector.broadcast %cst_27 : f32 to vector<16x1xf32>
    %48 = arith.divf %46, %47 : vector<16x1xf32>
    %49 = vector.broadcast %48 : vector<16x1xf32> to vector<16x32xf32>
    %50 = arith.subf %42, %49 : vector<16x32xf32>
    %51 = arith.mulf %50, %50 : vector<16x32xf32>
    %cst_28 = arith.constant dense<0.000000e+00> : vector<16xf32>
    %52 = vector.multi_reduction <add>, %51, %cst_28 [1] : vector<16x32xf32> to vector<16xf32>
    %53 = vector.shape_cast %52 : vector<16xf32> to vector<16x1xf32>
    %cst_29 = arith.constant 3.200000e+01 : f32
    %54 = vector.broadcast %cst_29 : f32 to vector<16x1xf32>
    %55 = arith.divf %53, %54 : vector<16x1xf32>
    %56 = vector.broadcast %48 : vector<16x1xf32> to vector<16x32xf32>
    %57 = arith.subf %42, %56 : vector<16x32xf32>
    %cst_30 = arith.constant 9.99999997E-7 : f32
    %58 = vector.broadcast %cst_30 : f32 to vector<16x1xf32>
    %59 = arith.addf %55, %58 : vector<16x1xf32>
    %60 = math.rsqrt %59 : vector<16x1xf32>
    %61 = vector.broadcast %60 : vector<16x1xf32> to vector<16x32xf32>
    %62 = arith.mulf %57, %61 : vector<16x32xf32>
    %63 = vector.broadcast %43 : vector<1x32xf32> to vector<16x32xf32>
    %64 = arith.mulf %62, %63 : vector<16x32xf32>
    %65 = vector.broadcast %44 : vector<1x32xf32> to vector<16x32xf32>
    %66 = arith.addf %64, %65 : vector<16x32xf32>
    %67 = vector.shape_cast %66 : vector<16x32xf32> to vector<2x8x32xf32>
    %c0_31 = arith.constant 0 : index
    %c0_32 = arith.constant 0 : index
    %68 = vector.load %arg2[%c0_31, %c0_32] : memref<2x8xf32, #tpu.memory_space<vmem>>, vector<2x8xf32>
    %cst_33 = arith.constant dense<0.000000e+00> : vector<2xf32>
    %69 = vector.multi_reduction <add>, %68, %cst_33 [1] : vector<2x8xf32> to vector<2xf32>
    %70 = vector.shape_cast %69 : vector<2xf32> to vector<2x1xf32>
    %cst_34 = arith.constant 1.000000e+00 : f32
    %71 = vector.broadcast %cst_34 : f32 to vector<2x1xf32>
    %72 = arith.maximumf %70, %71 : vector<2x1xf32>
    %73 = vector.extract_strided_slice %68 {offsets = [0, 0], sizes = [1, 8], strides = [1, 1]} : vector<2x8xf32> to vector<1x8xf32>
    %74 = vector.extract_strided_slice %67 {offsets = [0, 0, 0], sizes = [1, 8, 32], strides = [1, 1, 1]} : vector<2x8x32xf32> to vector<1x8x32xf32>
    %75 = vector.shape_cast %74 : vector<1x8x32xf32> to vector<8x32xf32>
    %cst_35 = arith.constant dense<0.000000e+00> : vector<1x32xf32>
    %76 = tpu.matmul %73, %75, %cst_35 {dimension_numbers = #tpu.dot_dimension_numbers<[1], [0], [0], [1], [0, 0, 1, 1], [], []>} : vector<1x8xf32>, vector<8x32xf32>, vector<1x32xf32> -> vector<1x32xf32>
    %77 = vector.extract_strided_slice %68 {offsets = [1, 0], sizes = [1, 8], strides = [1, 1]} : vector<2x8xf32> to vector<1x8xf32>
    %78 = vector.extract_strided_slice %67 {offsets = [1, 0, 0], sizes = [1, 8, 32], strides = [1, 1, 1]} : vector<2x8x32xf32> to vector<1x8x32xf32>
    %79 = vector.shape_cast %78 : vector<1x8x32xf32> to vector<8x32xf32>
    %cst_36 = arith.constant dense<0.000000e+00> : vector<1x32xf32>
    %80 = tpu.matmul %77, %79, %cst_36 {dimension_numbers = #tpu.dot_dimension_numbers<[1], [0], [0], [1], [0, 0, 1, 1], [], []>} : vector<1x8xf32>, vector<8x32xf32>, vector<1x32xf32> -> vector<1x32xf32>
    %81 = tpu.concatenate %76, %80 in 0 : vector<1x32xf32>, vector<1x32xf32> -> vector<2x32xf32>
    %82 = vector.broadcast %72 : vector<2x1xf32> to vector<2x32xf32>
    %83 = arith.divf %81, %82 : vector<2x32xf32>
    %84 = arith.truncf %39 : vector<2x32xf32> to vector<2x32xbf16>
    %c0_37 = arith.constant 0 : index
    %c0_38 = arith.constant 0 : index
    %85 = vector.load %arg9[%c0_37, %c0_38] : memref<32x32xbf16, #tpu.memory_space<vmem>>, vector<32x32xbf16>
    %cst_39 = arith.constant dense<0.000000e+00> : vector<2x32xf32>
    %86 = tpu.matmul %84, %85, %cst_39 {dimension_numbers = #tpu.dot_dimension_numbers<[1], [0], [0], [1], [0, 0, 1, 1], [], []>} : vector<2x32xbf16>, vector<32x32xbf16>, vector<2x32xf32> -> vector<2x32xf32>
    %c0_40 = arith.constant 0 : index
    %c0_41 = arith.constant 0 : index
    %87 = vector.load %arg10[%c0_40, %c0_41] : memref<1x32xf32, #tpu.memory_space<vmem>>, vector<1x32xf32>
    %88 = vector.broadcast %87 : vector<1x32xf32> to vector<2x32xf32>
    %89 = arith.addf %86, %88 : vector<2x32xf32>
    %90 = arith.truncf %83 : vector<2x32xf32> to vector<2x32xbf16>
    %c0_42 = arith.constant 0 : index
    %c0_43 = arith.constant 0 : index
    %91 = vector.load %arg11[%c0_42, %c0_43] : memref<32x32xbf16, #tpu.memory_space<vmem>>, vector<32x32xbf16>
    %cst_44 = arith.constant dense<0.000000e+00> : vector<2x32xf32>
    %92 = tpu.matmul %90, %91, %cst_44 {dimension_numbers = #tpu.dot_dimension_numbers<[1], [0], [0], [1], [0, 0, 1, 1], [], []>} : vector<2x32xbf16>, vector<32x32xbf16>, vector<2x32xf32> -> vector<2x32xf32>
    %c0_45 = arith.constant 0 : index
    %c0_46 = arith.constant 0 : index
    %93 = vector.load %arg12[%c0_45, %c0_46] : memref<1x32xf32, #tpu.memory_space<vmem>>, vector<1x32xf32>
    %94 = vector.broadcast %93 : vector<1x32xf32> to vector<2x32xf32>
    %95 = arith.addf %92, %94 : vector<2x32xf32>
    %96 = arith.mulf %89, %89 : vector<2x32xf32>
    %cst_47 = arith.constant dense<0.000000e+00> : vector<2xf32>
    %97 = vector.multi_reduction <add>, %96, %cst_47 [1] : vector<2x32xf32> to vector<2xf32>
    %98 = vector.shape_cast %97 : vector<2xf32> to vector<2x1xf32>
    %cst_48 = arith.constant 9.99999996E-13 : f32
    %99 = vector.broadcast %cst_48 : f32 to vector<2x1xf32>
    %100 = arith.addf %98, %99 : vector<2x1xf32>
    %101 = math.rsqrt %100 : vector<2x1xf32>
    %102 = vector.broadcast %101 : vector<2x1xf32> to vector<2x32xf32>
    %103 = arith.mulf %89, %102 : vector<2x32xf32>
    %104 = arith.mulf %95, %95 : vector<2x32xf32>
    %cst_49 = arith.constant dense<0.000000e+00> : vector<2xf32>
    %105 = vector.multi_reduction <add>, %104, %cst_49 [1] : vector<2x32xf32> to vector<2xf32>
    %106 = vector.shape_cast %105 : vector<2xf32> to vector<2x1xf32>
    %cst_50 = arith.constant 9.99999996E-13 : f32
    %107 = vector.broadcast %cst_50 : f32 to vector<2x1xf32>
    %108 = arith.addf %106, %107 : vector<2x1xf32>
    %109 = math.rsqrt %108 : vector<2x1xf32>
    %110 = vector.broadcast %109 : vector<2x1xf32> to vector<2x32xf32>
    %111 = arith.mulf %95, %110 : vector<2x32xf32>
    %c0_51 = arith.constant 0 : index
    %c0_52 = arith.constant 0 : index
    %112 = memref.load %arg13[%c0_51, %c0_52] : memref<1x1xf32, #tpu.memory_space<smem>>
    %113 = math.exp %112 : f32
    %c0_53 = arith.constant 0 : index
    %c0_54 = arith.constant 0 : index
    %114 = memref.load %arg14[%c0_53, %c0_54] : memref<1x1xf32, #tpu.memory_space<smem>>
    %cst_55 = arith.constant dense<0.000000e+00> : vector<2x2xf32>
    %115 = tpu.matmul %103, %111, %cst_55 {dimension_numbers = #tpu.dot_dimension_numbers<[1], [1], [0], [0], [0, 0, 1, 0], [], []>} : vector<2x32xf32>, vector<2x32xf32>, vector<2x2xf32> -> vector<2x2xf32>
    %116 = vector.broadcast %113 : f32 to vector<2x2xf32>
    %117 = arith.mulf %115, %116 : vector<2x2xf32>
    %118 = vector.broadcast %114 : f32 to vector<2x2xf32>
    %119 = arith.addf %117, %118 : vector<2x2xf32>
    %120 = tpu.iota {dimensions = array<i32: 0>} : vector<2x2xi32>
    %121 = tpu.iota {dimensions = array<i32: 1>} : vector<2x2xi32>
    %122 = arith.cmpi eq, %120, %121 : vector<2x2xi32>
    %cst_56 = arith.constant 1.000000e+00 : f32
    %cst_57 = arith.constant -1.000000e+00 : f32
    %123 = vector.broadcast %cst_56 : f32 to vector<2x2xf32>
    %124 = vector.broadcast %cst_57 : f32 to vector<2x2xf32>
    %125 = arith.select %122, %123, %124 : vector<2x2xi1>, vector<2x2xf32>
    %cst_58 = arith.constant 0.000000e+00 : f32
    %126 = vector.broadcast %cst_58 : f32 to vector<2x2xf32>
    %127 = arith.subf %126, %125 : vector<2x2xf32>
    %128 = arith.mulf %127, %119 : vector<2x2xf32>
    %cst_59 = arith.constant 0.000000e+00 : f32
    %129 = vector.broadcast %cst_59 : f32 to vector<2x2xf32>
    %130 = arith.maximumf %128, %129 : vector<2x2xf32>
    %131 = math.absf %128 : vector<2x2xf32>
    %cst_60 = arith.constant 0.000000e+00 : f32
    %132 = vector.broadcast %cst_60 : f32 to vector<2x2xf32>
    %133 = arith.subf %132, %131 : vector<2x2xf32>
    %134 = math.exp %133 : vector<2x2xf32>
    %135 = math.log1p %134 : vector<2x2xf32>
    %136 = arith.addf %130, %135 : vector<2x2xf32>
    %137 = vector.shape_cast %136 : vector<2x2xf32> to vector<1x2x2xf32>
    %cst_61 = arith.constant dense<0.000000e+00> : vector<1xf32>
    %138 = vector.multi_reduction <add>, %137, %cst_61 [1, 2] : vector<1x2x2xf32> to vector<1xf32>
    %139 = vector.shape_cast %138 : vector<1xf32> to vector<1x1x1xf32>
    %140 = vector.extract %139[0, 0, 0] : f32 from vector<1x1x1xf32>
    %cst_62 = arith.constant 2.000000e+00 : f32
    %141 = arith.divf %140, %cst_62 : f32
    %c0_63 = arith.constant 0 : index
    %c0_64 = arith.constant 0 : index
    %142 = memref.load %arg16[%c0_63, %c0_64] : memref<1x1xf32, #tpu.memory_space<smem>>
    memref.store %141, %arg16[%c0_63, %c0_64] : memref<1x1xf32, #tpu.memory_space<smem>>
    return
  }
}

</mosaic_0001>

<bundles_post_ra>
// kernel: siglip_model_forward.5
= control target key start
LH: loop header
LB: loop body
LE: loop exit
PB: predicated region body
PF: predicated region fallthrough
CT: control target
= control target key end

     0   :  { %s508_s15 = smov 0   ;;  %s571_s0 = inlined_call_operand.vmem [shape: f32[2,4,192], index: 0, kind: input, shape index: {}]   ;;  %s572_s1 = inlined_call_operand.vmem [shape: bf16[192,32], index: 1, kind: input, shape index: {}]   ;;  %s573_s2 = inlined_call_operand.vmem [shape: f32[1,32], index: 2, kind: input, shape index: {}]   ;;  %s574_s3 = inlined_call_operand.vmem [shape: f32[1,4,32], index: 3, kind: input, shape index: {}]   ;;  %s575_s4 = inlined_call_operand.vmem [shape: bf16[2,4,32], index: 4, kind: output, shape index: {}]  }
   0x1 LB: > { %s394_s16 = sadd.s32 4294967295, %s481_s15   ;;  %p398_p0 = scmp.ge.s32.totalorder %s481_s15, 1  ;;  %s481_s15 = sphi %s508_s15, %s14_s15  }
   0x2   : > { %p162_p1 = scmp.lt.s32.totalorder %s481_s15, 3 }
   0x4   : > { %p163_p2 = pnand %p398_p0, %p162_p1 }
   0x5   : > { %p187_p3 = scmp.lt.s32.totalorder (!%p163_p2), %s394_s16, 1 }
   0x6   : > { %166 = sbr.rel (%p163_p2) target bundleno = 178 (0xb2), region = 36 }
   0xb   : > { %v461_v0 = vld [vmem:[%s572_s1 + $0x38] sm:$0xff]  ;;  %v460_v2 = vld [vmem:[%s572_s1 + $0x30] sm:$0xff]  ;;  %s577_s16 = smov (!%p187_p3, %s394_s16), 1  ;;  %v459_v4 = vld [vmem:[%s572_s1 + $0x28] sm:$0xff]  ;;  %vm306_vm0 = vcmask 523264   ;;  %vm339_vm1 = vcmask 254976  }
   0xc   : > { %v465_v1 = vld [vmem:[%s572_s1 + $0x58] sm:$0xff]  ;;  %310 = vmatpush.bf16.msra.mxu0 %v461_v0  ;;  %v464_v3 = vld [vmem:[%s572_s1 + $0x50] sm:$0xff]  ;;  %s453_s25 = sshll.u32 %s577_s16, 3  ;;  %v463_v6 = vld [vmem:[%s572_s1 + $0x48] sm:$0xff] }
   0xd   : > { %327 = vmatpush.bf16.msra.mxu1 %v465_v1  ;;  %s191_s28 = scalar_lea.vmem %s571_s0, %s453_s25  ;;  %v458_v7 = vld [vmem:[%s572_s1 + $0x20] sm:$0xff]  ;;  %v457_v9 = vld [vmem:[%s572_s1 + $0x18] sm:$0xff]  ;;  %v456_v12 = vld [vmem:[%s572_s1 + $0x10] sm:$0xff]  ;;  %s401_s25 = sshll.u32 %s577_s16, 1 }
   0xe   : > { %v197_v5 = vld [vmem:[%s191_s28] sm:$0xff]  ;;  %v455_v13 = vld [vmem:[%s572_s1 + $0x8] sm:$0xff]  ;;  %s195_s28 = scalar_lea.vmem %s575_s4, %s401_s25 }
   0xf   : > { %199 = vst [vmem:[#allocation1] ss:$2 sm:$0xff] %v197_v5  ;;  %v462_v8 = vld [vmem:[%s572_s1 + $0x40] sm:$0xff] }
  0x10   : > { %311 = vmatpush.bf16.msra.mxu0 %v460_v2  ;;  %v454_v14 = vld [vmem:[%s572_s1] sm:$0xff] }
  0x11   : > { %328 = vmatpush.bf16.msra.mxu1 %v464_v3  ;;  %v474_v19 = vld [vmem:[%s573_s2] ss:$0 sm:$0xff] }
  0x12   : > { %v336_v22 = vld [vmem:[%s574_s3] sm:$0xf] }
  0x14   : > { %312 = vmatpush.bf16.msra.mxu0 %v459_v4 }
  0x15   : > { %329 = vmatpush.bf16.msra.mxu1 %v463_v6 }
  0x16   : > { %v201_v10 = vld.sshfl [vmem:[#allocation1 + $0x8] sm:$0xff pattern:$0x75316420]  ;;  %v200_v15 = vld.sshfl [vmem:[#allocation1] sm:$0xff pattern:$0x75316420] }
  0x17   : > { %v205_v11 = vpack.c.bf16 %v201_v10, %v201_v10  ;;  %v204_v16 = vpack.c.bf16 %v200_v15, %v200_v15 }
  0x18   : > { %313 = vmatpush.bf16.msra.mxu0 %v458_v7 }
  0x19   : > { %330 = vmatpush.bf16.msra.mxu1 %v462_v8 }
  0x1c   : > { %314 = vmatpush.bf16.msra.mxu0 %v457_v9  ;;  %450 = vmatmul.msk.bf16.vlgmr.msra.gmra.mxu1 %vm306_vm0, %v205_v11 }
  0x20   : > { %315 = vmatpush.bf16.msra.mxu0 %v456_v12 }
  0x24   : > { %316 = vmatpush.bf16.msra.mxu0 %v455_v13 }
  0x28   : > { %317 = vmatpush.bf16.msra.mxu0 %v454_v14 }
  0x2b   : > { %318 = vmatmul.bf16.vlgmr.msra.gmra.mxu0 %v204_v16 }
  0x99   : > { %v332_v17 = vpop.f32.mrf.mxu1 }
  0xa1   : > { %v334_v18 = vpop.f32.mrf.mxu1 }
  0xa8   : > { %v319_v20 = vpop.f32.mrf.mxu0 }
  0xa9   : > { %v320_v21 = vadd.f32 %v474_v19, %v319_v20 }
  0xab   : > { %v333_v23 = vadd.f32 %v332_v17, %v320_v21 }
  0xad   : > { %v337_v24 = vadd.f32 %v336_v22, %v333_v23 }
  0xaf   : > { %v338_v25 = vpack.c.bf16 %v337_v24, %v337_v24 }
  0xb0   : > { %v321_v26 = vpop.f32.mrf.mxu0 }
  0xb1   : > { %340 = vst.msk [vmem:[%s195_s28] sm:$0x3] %vm339_vm1, %v338_v25 }
  0xb2 PF: > { %s14_s15 = sadd.s32 1, %s481_s15  }
  0xb3   : > { %p11_p4 = scmp.ge.s32.totalorder %s14_s15, 4  }
  0xb5   :  { %13 = sbr.rel (!%p11_p4) target bundleno = 1 (0x1), region = 66 }

// kernel: siglip_model_forward.9
= control target key start
LH: loop header
LB: loop body
LE: loop exit
PB: predicated region body
PF: predicated region fallthrough
CT: control target
= control target key end

     0   :  { %s907_s0 = inlined_call_operand.vmem [shape: bf16[2,4,32], index: 0, kind: input, shape index: {}]   ;;  %s908_s1 = inlined_call_operand.vmem [shape: bf16[2,8,32], index: 1, kind: input, shape index: {}]   ;;  %s909_s2 = inlined_call_operand.vmem [shape: f32[2,8], index: 2, kind: input, shape index: {}]   ;;  %s910_s3 = inlined_call_operand.vmem [shape: f32[1,32], index: 3, kind: input, shape index: {}]   ;;  %s911_s4 = inlined_call_operand.vmem [shape: f32[1,32], index: 4, kind: input, shape index: {}]   ;;  %s912_s5 = inlined_call_operand.vmem [shape: f32[1,32], index: 5, kind: input, shape index: {}]   ;;  %s913_s6 = inlined_call_operand.vmem [shape: f32[1,32], index: 6, kind: input, shape index: {}]   ;;  %s914_s7 = inlined_call_operand.vmem [shape: bf16[32,128], index: 7, kind: input, shape index: {}]   ;;  %s915_s8 = inlined_call_operand.vmem [shape: f32[1,128], index: 8, kind: input, shape index: {}]   ;;  %s916_s9 = inlined_call_operand.vmem [shape: bf16[32,32], index: 9, kind: input, shape index: {}]   ;;  %s917_s10 = inlined_call_operand.vmem [shape: f32[1,32], index: 10, kind: input, shape index: {}]   ;;  %s918_s11 = inlined_call_operand.vmem [shape: bf16[32,32], index: 11, kind: input, shape index: {}]   ;;  %s919_s12 = inlined_call_operand.vmem [shape: f32[1,32], index: 12, kind: input, shape index: {}]   ;;  %s920_s13 = inlined_call_operand.<no memory space> [shape: f32[1,1], index: 13, kind: input, shape index: {}]   ;;  %s921_s14 = inlined_call_operand.<no memory space> [shape: f32[1,1], index: 14, kind: input, shape index: {}]   ;;  %s922_s15 = inlined_call_operand.hbm [shape: f32[2,128], index: 15, kind: output, shape index: {0}]   ;;  %s923_s16 = inlined_call_operand.hbm [shape: f32[1,1], index: 16, kind: output, shape index: {1}]  }
   0x1   :  { %925 = sst [smem:[#allocation10_spill]] %s907_s0 }
   0x2   :  { %24 = vsyncpa [#allocation5], 0  ;;  %vm70_vm0 = vcmask 261120   ;;  %v614_v0 = vld [vmem:[%s908_s1] sm:$0xff]   ;;  %s926_s25 = sld [smem:[#allocation10_spill]] }
   0x3   :  { %v616_v3 = vunpack.c.h.bf16 %v614_v0 }
   0x5   :  { %v226_v6 = vsel %vm70_vm0, %v616_v3, 0.0 }
   0x6   :  { %227 = vadd.xlane.f32.xlu0 %v226_v6 }
   0x8   :  { %v57_v1 = vld [vmem:[%s926_s25] sm:$0x3]  ;;  %v58_v2 = vld [vmem:[%s926_s25 + $0x2] sm:$0x3] }
   0x9   :  { %v59_v4 = vunpack.c.l.bf16 %v57_v1  ;;  %v60_v5 = vunpack.c.l.bf16 %v58_v2 }
   0xb   :  { %65 = vst [vmem:[#allocation1] ss:$2 sm:$0xff] %v59_v4 }
   0xc   :  { %67 = vst [vmem:[#allocation1 + $0x1] ss:$2 sm:$0xff] %v60_v5 }
   0xd   :  { %25 = vsyncpa [#allocation6], 0  ;;  %v615_v7 = vunpack.c.l.bf16 %v614_v0  ;;  %v702_v11 = vmov 32.0   ;;  %v703_v21 = vmov 839922192   ;;  %vm278_vm2 = vcmask 58368  }
   0xe   :  { %638 = vrcp.f32 %v702_v11  ;;  %v807_v22 = vunpack.c.l.s4 %v703_v21  ;;  %v704_v23 = vmov 1985246804   ;;  %v835_v44 = vld [vmem:[%s909_s2] sm:$0x3]  ;;  %v608_v54 = vld [vmem:[%s914_s7 + $0x8] sm:$0xff]  ;;  %vm283_vm7 = vcmask 64512  }
   0xf   :  { %v223_v8 = vsel %vm70_vm0, %v615_v7, 0.0  ;;  %v809_v24 = vunpack.c.l.s4 %v704_v23  ;;  %v279_v45 = vsel %vm278_vm2, %v835_v44, 0.0  ;;  %185 = vmatpush.bf16.msra.mxu0 %v608_v54  ;;  %v607_v56 = vld [vmem:[%s914_s7] sm:$0xff]  ;;  %v705_v23 = vmov 4.0   ;;  %s552_s7 = sshll.u32 %s922_s15, 4  ;;  %s553_s7 = int_to_ptr.hbm [resolvable:$true] %s552_s7 }
  0x10   :  { %224 = vadd.xlane.f32.xlu0 %v223_v8  ;;  %v85_v28 = vunpack.c.0.s8 %v807_v22  ;;  %v631_v0 = vld [vmem:[%s912_s5] ss:$0 sm:$0xff]  ;;  %vm193_vm13 = vcmask 257024   ;;  %vm161_vm14 = vcmask 1041409   ;;  %s561_s5 = sshll.u32 %s923_s16, 4  ;;  %s562_s5 = int_to_ptr.hbm [resolvable:$true] %s561_s5 }
  0x11   :  { %v89_v29 = vunpack.c.0.s8 %v809_v24 }
  0x13   :  { %v68_v9 = vld.sshfl [vmem:[#allocation1] sm:$0xff pattern:$0x75316420]  ;;  %186 = vmatpush.bf16.msra.mxu0 %v607_v56 }
  0x14   :  { %v71_v10 = vsel %vm70_vm0, %v68_v9, 0.0  ;;  %v639_v12 = vpop.eup %638  ;;  %v307_v9 = vrot.slane %v835_v44, 1 }
  0x15   :  { %72 = vadd.xlane.f32.xlu2 %v71_v10  ;;  %v75_v13 = vmul.f32 32.0, %v639_v12  ;;  %vm79_vm1 = vweird.f32 %v639_v12 }
  0x17   :  { %v76_v14 = vsub.f32 1.0, %v75_v13 }
  0x18   :  { %280 = vadd.xlane.f32.xlu0 %v279_v45 }
  0x19   :  { %v77_v15 = vmul.f32 %v639_v12, %v76_v14  ;;  %v609_v14 = vld [vmem:[%s916_s9] sm:$0xff] }
  0x1b   :  { %v78_v16 = vadd.f32 %v639_v12, %v77_v15 }
  0x1d   :  { %v80_v17 = vsel %vm79_vm1, %v639_v12, %v78_v16  ;;  %v610_v12 = vld [vmem:[%s916_s9 + $0x8] sm:$0xff]  ;;  %s709_s9 = smov [#allocation7]  }
  0x1e   :  { %387 = vmatpush.bf16.msra.mxu3 %v610_v12  ;;  %v611_v12 = vld [vmem:[%s918_s11] sm:$0xff] }
  0x22   :  { %388 = vmatpush.bf16.msra.mxu3 %v609_v14 }
  0x79   :  { %v228_v18 = vpop.xlane.xlu0 %227 }
  0x7a   :  { %v230_v19 = vmul.f32 %v228_v18, %v80_v17 }
  0x7c   :  { %v232_v20 = vsub.f32 %v616_v3, %v230_v19 }
  0x7e   :  { %v234_v25 = vmul.f32 %v232_v20, %v232_v20 }
  0x80   :  { %v238_v26 = vsel %vm70_vm0, %v234_v25, 0.0 }
  0x81   :  { %239 = vadd.xlane.f32.xlu1 %v238_v26  ;;  %v633_v26 = vld [vmem:[%s910_s3] ss:$0 sm:$0xff] }
  0x83   :  { %v225_v27 = vpop.xlane.xlu0 %224 }
  0x84   :  { %v229_v30 = vmul.f32 %v225_v27, %v80_v17 }
  0x86   :  { %v814_v33 = vsub.f32 %v615_v7, %v229_v30  ;;  %v634_v30 = vld [vmem:[%s911_s4] ss:$0 sm:$0xff] }
  0x88   :  { %v73_v31 = vpop.xlane.xlu2 %72  ;;  %v233_v36 = vmul.f32 %v814_v33, %v814_v33 }
  0x89   :  { %v81_v32 = vmul.f32 %v80_v17, %v73_v31 }
  0x8a   :  { %v235_v39 = vsel %vm70_vm0, %v233_v36, 0.0 }
  0x8b   :  { %v86_v34 = vperm.slane %v81_v32, %v85_v28  ;;  %v90_v35 = vperm.slane %v81_v32, %v89_v29  ;;  %236 = vadd.xlane.f32.xlu1 %v235_v39 }
  0x8d   :  { %v822_v37 = vsub.f32 %v59_v4, %v86_v34  ;;  %v824_v38 = vsub.f32 %v60_v5, %v90_v35  ;;  %v632_v5 = vld [vmem:[%s913_s6] ss:$0 sm:$0xff]  ;;  %v135_v35 = vrot.slane %v633_v26, 4 }
  0x8f   :  { %v95_v40 = vmul.f32 %v822_v37, %v822_v37  ;;  %v96_v41 = vmul.f32 %v824_v38, %v824_v38 }
  0x91   :  { %99 = vst [vmem:[#allocation1] ss:$2 sm:$0xff] %v95_v40  ;;  %v142_v40 = vrot.slane %v634_v30, 4 }
  0x92   :  { %101 = vst [vmem:[#allocation1 + $0x1] ss:$2 sm:$0xff] %v96_v41 }
  0x99   :  { %v102_v42 = vld.sshfl [vmem:[#allocation1] sm:$0xff pattern:$0x75316420] }
  0x9a   :  { %v104_v43 = vsel %vm70_vm0, %v102_v42, 0.0 }
  0x9b   :  { %105 = vadd.xlane.f32.xlu2 %v104_v43 }
  0xf4   :  { %v240_v46 = vpop.xlane.xlu1 %239 }
  0xf5   :  { %v242_v47 = vmul.f32 %v240_v46, %v80_v17 }
  0xf7   :  { %v244_v48 = vadd.f32 1e-06, %v242_v47 }
  0xf9   :  { %640 = vrsqrt.f32 %v244_v48  ;;  %vm261_vm4 = vweird.f32 %v244_v48 }
  0xfe   :  { %v237_v49 = vpop.xlane.xlu1 %236 }
  0xff   :  { %v241_v50 = vmul.f32 %v237_v49, %v80_v17  ;;  %v641_v51 = vpop.eup %640 }
 0x100   :  { %v256_v53 = vmul.f32 %v641_v51, %v244_v48  ;;  %vm262_vm3 = vweird.f32 %v641_v51 }
 0x101   :  { %v243_v52 = vadd.f32 1e-06, %v241_v50  ;;  %vm263_vm5 = vmor %vm261_vm4, %vm262_vm3  ;;  %vm333_vm4 = vcmask 1040384  }
 0x102   :  { %v257_v55 = vmul.f32 %v641_v51, %v256_v53 }
 0x103   :  { %642 = vrsqrt.f32 %v243_v52  ;;  %vm251_vm8 = vweird.f32 %v243_v52 }
 0x104   :  { %v258_v57 = vmul.f32 0.5, %v257_v55 }
 0x106   :  { %v259_v58 = vsub.f32 1.5, %v258_v57 }
 0x108   :  { %v260_v62 = vmul.f32 %v641_v51, %v259_v58 }
 0x109   :  { %v643_v59 = vpop.eup %642 }
 0x10a   :  { %v246_v60 = vmul.f32 %v643_v59, %v243_v52  ;;  %v264_v2 = vsel %vm263_vm5, %v641_v51, %v260_v62  ;;  %vm252_vm6 = vweird.f32 %v643_v59 }
 0x10b   :  { %v266_v4 = vmul.f32 %v264_v2, %v232_v20  ;;  %vm253_vm9 = vmor %vm251_vm8, %vm252_vm6  ;;  %vm432_vm6 = vcmask 254976  }
 0x10c   :  { %v247_v1 = vmul.f32 %v643_v59, %v246_v60 }
 0x10d   :  { %v271_v7 = vmul.f32 %v631_v0, %v266_v4 }
 0x10e   :  { %v106_v61 = vpop.xlane.xlu2 %105  ;;  %v248_v6 = vmul.f32 0.5, %v247_v1 }
 0x10f   :  { %v107_v63 = vmul.f32 %v106_v61, %v80_v17  ;;  %v276_v10 = vadd.f32 %v632_v5, %v271_v7 }
 0x110   :  { %v249_v8 = vsub.f32 1.5, %v248_v6 }
 0x111   :  { %v108_v3 = vadd.f32 1e-06, %v107_v63  ;;  %325 = vmatpush.msra.mxu2 %v276_v10  ;;  %v612_v10 = vld [vmem:[%s918_s11 + $0x8] sm:$0xff] }
 0x112   :  { %v250_v11 = vmul.f32 %v643_v59, %v249_v8  ;;  %586 = vmatmul.msk.f32.vlgmr.msra.gmra.mxu2 %vm283_vm7, %v307_v9  ;;  %v281_v9 = vpop.xlane.xlu0 %280 }
 0x113   :  { %644 = vrsqrt.f32 %v108_v3  ;;  %vm115_vm10 = vweird.f32 %v108_v3 }
 0x114   :  { %v254_v13 = vsel %vm253_vm9, %v643_v59, %v250_v11  ;;  %646 = vrcp.f32 %v705_v23  ;;  %v282_v11 = vmax.f32 %v281_v9, 1.0 }
 0x115   :  { %v265_v16 = vmul.f32 %v254_v13, %v814_v33 }
 0x116   :  { %648 = vrcp.f32 %v282_v11  ;;  %vm340_vm1 = vweird.f32 %v282_v11 }
 0x117   :  { %v270_v18 = vmul.f32 %v631_v0, %v265_v16 }
 0x119   :  { %v645_v15 = vpop.eup %644  ;;  %v275_v20 = vadd.f32 %v632_v5, %v270_v18 }
 0x11a   :  { %v110_v17 = vmul.f32 %v645_v15, %v108_v3  ;;  %vm116_vm11 = vweird.f32 %v645_v15  ;;  %v647_v31 = vpop.eup %646 }
 0x11b   :  { %302 = vmatpush.msra.mxu1 %v275_v20  ;;  %vm117_vm12 = vmor %vm115_vm10, %vm116_vm11  ;;  %v209_v41 = vmul.f32 4.0, %v647_v31  ;;  %vm213_vm15 = vweird.f32 %v647_v31 }
 0x11c   :  { %v111_v19 = vmul.f32 %v645_v15, %v110_v17  ;;  %585 = vmatmul.msk.f32.vlgmr.msra.gmra.mxu1 %vm283_vm7, %v835_v44  ;;  %v649_v13 = vpop.eup %648  ;;  %v346_v17 = vand.u32 2147483648, %v282_v11 }
 0x11d   :  { %v210_v46 = vsub.f32 1.0, %v209_v41  ;;  %424 = vmatpush.bf16.msrb.mxu1 %v612_v10  ;;  %v336_v14 = vmul.f32 %v649_v13, %v282_v11  ;;  %vm341_vm2 = vweird.f32 %v649_v13 }
 0x11e   :  { %v112_v21 = vmul.f32 0.5, %v111_v19  ;;  %v344_v19 = vand.u32 2147483647, %v282_v11  ;;  %vm342_vm3 = vmor %vm340_vm1, %vm341_vm2  ;;  %v347_v20 = vor.u32 1.1754944e-38, %v346_v17  ;;  %v498_v11 = vstv %s921_s14  ;;  %s707_s14 = smov [#allocation4]  }
 0x11f   :  { %v211_v50 = vmul.f32 %v647_v31, %v210_v46  ;;  %s550_s0 = sshll.u32 %s707_s14, 4  ;;  %s551_s0 = int_to_ptr.vmem [resolvable:$true] %s550_s0 }
 0x120   :  { %v113_v25 = vsub.f32 1.5, %v112_v21  ;;  %vm345_vm5 = vcmp.eq.f32.partialorder %v344_v19, 8.507059e+37 }
 0x121   :  { %v212_v56 = vadd.f32 %v647_v31, %v211_v50  ;;  %425 = vmatpush.bf16.msrb.mxu1 %v611_v12 }
 0x122   :  { %v114_v27 = vmul.f32 %v645_v15, %v113_v25 }
 0x123   :  { %v214_v62 = vsel %vm213_vm15, %v647_v31, %v212_v56 }
 0x124   :  { %v118_v32 = vsel %vm117_vm12, %v645_v15, %v114_v27  ;;  %v337_v15 = vsub.f32 1.0, %v336_v14 }
 0x125   :  { %v123_v33 = vperm.slane %v118_v32, %v85_v28  ;;  %v127_v34 = vperm.slane %v118_v32, %v89_v29 }
 0x126   :  { %v338_v16 = vmul.f32 %v649_v13, %v337_v15 }
 0x127   :  { %v130_v36 = vmul.f32 %v123_v33, %v822_v37  ;;  %v131_v39 = vmul.f32 %v127_v34, %v824_v38  ;;  %v635_v33 = vld [vmem:[%s915_s8] ss:$0 sm:$0xff] }
 0x128   :  { %v339_v18 = vadd.f32 %v649_v13, %v338_v16 }
 0x129   :  { %v137_v42 = vmul.f32 %v633_v26, %v130_v36  ;;  %v138_v43 = vmul.f32 %v135_v35, %v131_v39  ;;  %v636_v39 = vld [vmem:[%s917_s10] ss:$0 sm:$0xff] }
 0x12a   :  { %v343_v23 = vsel %vm342_vm3, %v649_v13, %v339_v18 }
 0x12b   :  { %v144_v44 = vadd.f32 %v634_v30, %v137_v42  ;;  %v145_v45 = vadd.f32 %v142_v40, %v138_v43  ;;  %v348_v30 = vsel %vm345_vm5, %v347_v20, %v343_v23 }
 0x12d   :  { %v146_v47 = vpack.c.bf16 %v144_v44, %v144_v44  ;;  %v147_v48 = vpack.c.bf16 %v145_v45, %v145_v45  ;;  %v194_v22 = vsel %vm193_vm13, %v144_v44, 0.0  ;;  %v201_v28 = vsel %vm193_vm13, %v145_v45, 0.0  ;;  %v637_v45 = vld [vmem:[%s919_s12] ss:$0 sm:$0xff] }
 0x12e   :  { %v195_v49 = vrot.slane %v194_v22, 4  ;;  %v202_v24 = vrot.slane %v201_v28, 4 }
 0x12f   :  { %v159_v29 = vunpack.c.l.b16 %v147_v48  ;;  %v158_v38 = vunpack.c.l.b16 %v146_v47 }
 0x130   :  { %v196_v37 = vadd.f32 %v195_v49, %v194_v22  ;;  %v203_v51 = vadd.f32 %v202_v24, %v201_v28 }
 0x131   :  { %v160_v52 = vrot.slane %v159_v29, 7  ;;  %v465_v29 = vstv %s920_s13 }
 0x132   :  { %v197_v53 = vrot.slane %v196_v37, 2  ;;  %v204_v54 = vrot.slane %v203_v51, 2  ;;  %v466_v50 = vmul.f32 1.442695, %v465_v29 }
 0x133   :  { %v162_v55 = vsel %vm161_vm14, %v160_v52, %v158_v38 }
 0x134   :  { %v163_v57 = vpack.c.b16 %v162_v55, %v162_v55  ;;  %v198_v58 = vadd.f32 %v197_v53, %v196_v37  ;;  %v205_v59 = vadd.f32 %v204_v54, %v203_v51 }
 0x136   :  { %584 = vmatmul.msk.bf16.vlgmr.msra.gmra.mxu0 %vm70_vm0, %v163_v57  ;;  %v199_v60 = vrot.slane %v198_v58, 1  ;;  %v206_v61 = vrot.slane %v205_v59, 1 }
 0x138   :  { %v200_v63 = vadd.f32 %v199_v60, %v198_v58  ;;  %v207_v0 = vadd.f32 %v206_v61, %v205_v59 }
 0x13a   :  { %v215_v1 = vmul.f32 %v214_v62, %v200_v63  ;;  %v216_v2 = vmul.f32 %v214_v62, %v207_v0 }
 0x13c   :  { %v350_v3 = vpack.c.bf16 %v215_v1, %v215_v1  ;;  %v351_v4 = vpack.c.bf16 %v216_v2, %v216_v2 }
 0x13e   :  { %v362_v5 = vunpack.c.l.b16 %v350_v3  ;;  %v363_v6 = vunpack.c.l.b16 %v351_v4  ;;  %v500_v4 = vlaneseq }
 0x140   :  { %v364_v7 = vsel %vm161_vm14, %v363_v6, %v362_v5  ;;  %v501_v5 = vshrl.u32 %v500_v4, 7  ;;  %v503_v6 = vand.u32 127, %v500_v4  ;;  %vm523_vm14 = vcmask 9216  }
 0x141   :  { %v365_v8 = vpack.c.b16 %v364_v7, %v364_v7 }
 0x142   :  { %vm504_vm13 = vcmp.eq.s32.totalorder %v501_v5, %v503_v6 }
 0x143   :  { %595 = vmatmul.msk.bf16.vlgmr.msra.gmra.mxu3 %vm70_vm0, %v365_v8  ;;  %v706_v8 = vmov -1.0  }
 0x144   :  { %v505_v9 = vsel %vm504_vm13, 1.0, %v706_v8 }
 0x145   :  { %v506_v13 = vsub.f32 0.0, %v505_v9 }
 0x195   :  { %v327_v21 = vpop.f32.mrf.mxu2 }
 0x196   :  { %v331_v25 = vrot.slane %v327_v21, 7 }
 0x199   :  { %v304_v26 = vpop.f32.mrf.mxu1 }
 0x19a   :  { %v334_v27 = vsel %vm333_vm4, %v304_v26, %v331_v25 }
 0x19b   :  { %v349_v31 = vmul.f32 %v348_v30, %v334_v27 }
 0x19d   :  { %v394_v32 = vpack.c.bf16 %v349_v31, %v349_v31 }
 0x19f   :  { %604 = vmatmul.msk.bf16.vlgmr.msrb.gmra.mxu1 %vm70_vm0, %v394_v32 }
 0x1b3   :  { %v188_v34 = vpop.f32.mrf.mxu0 }
 0x1b4   :  { %v189_v35 = vadd.f32 %v635_v33, %v188_v34 }
 0x1b6   :  { %192 = vst [vmem:[#allocation4] sm:$0x3] %v189_v35  ;;  %v708_v35 = vmov 2.0  }
 0x1b7   :  { %555 = dma.vmem_to_hbm [thread:$0]  %s551_s0, 32, %s553_s7, [#allocation5]  }
 0x1bb   :  { %v190_v36 = vpop.f32.mrf.mxu0 }
 0x1c6   :  { %v390_v40 = vpop.f32.mrf.mxu3 }
 0x1c7   :  { %v391_v41 = vadd.f32 %v636_v39, %v390_v40 }
 0x1c9   :  { %v431_v42 = vmul.f32 %v391_v41, %v391_v41 }
 0x1cb   :  { %v433_v43 = vsel %vm432_vm6, %v431_v42, 0.0 }
 0x1cc   :  { %434 = vadd.xlane.f32.xlu2 %v433_v43 }
 0x1ce   :  { %v392_v44 = vpop.f32.mrf.mxu3 }
 0x21c   :  { %v427_v46 = vpop.f32.mrf.mxu1 }
 0x21d   :  { %v428_v47 = vadd.f32 %v637_v45, %v427_v46 }
 0x21f   :  { %v448_v48 = vmul.f32 %v428_v47, %v428_v47 }
 0x221   :  { %v449_v22 = vsel %vm432_vm6, %v448_v48, 0.0 }
 0x222   :  { %450 = vadd.xlane.f32.xlu1 %v449_v22 }
 0x224   :  { %v429_v28 = vpop.f32.mrf.mxu1 }
 0x23f   :  { %v435_v49 = vpop.xlane.xlu2 %434 }
 0x240   :  { %v436_v24 = vadd.f32 1e-12, %v435_v49 }
 0x242   :  { %650 = vrsqrt.f32 %v436_v24  ;;  %vm443_vm10 = vweird.f32 %v436_v24 }
 0x243   :  { %652 = vpow2.f32 %v466_v50 }
 0x248   :  { %v651_v37 = vpop.eup %650 }
 0x249   :  { %v438_v38 = vmul.f32 %v651_v37, %v436_v24  ;;  %v653_v53 = vpop.eup %652  ;;  %vm444_vm8 = vweird.f32 %v651_v37 }
 0x24a   :  { %617 = vpush %v653_v53  ;;  %vm445_vm12 = vmor %vm443_vm10, %vm444_vm8 }
 0x24b   :  { %v439_v54 = vmul.f32 %v651_v37, %v438_v38 }
 0x24d   :  { %v440_v56 = vmul.f32 0.5, %v439_v54 }
 0x24f   :  { %v441_v59 = vsub.f32 1.5, %v440_v56 }
 0x251   :  { %v442_v62 = vmul.f32 %v651_v37, %v441_v59 }
 0x253   :  { %v446_v1 = vsel %vm445_vm12, %v651_v37, %v442_v62 }
 0x254   :  { %v447_v3 = vmul.f32 %v446_v1, %v391_v41 }
 0x27b   :  { %s618_s12 = spop %617 }
 0x27c   :  { %v496_v7 = vstv %s618_s12 }
 0x295   :  { %v451_v51 = vpop.xlane.xlu1 %450 }
 0x296   :  { %v452_v52 = vadd.f32 1e-12, %v451_v51 }
 0x298   :  { %654 = vrsqrt.f32 %v452_v52  ;;  %vm459_vm9 = vweird.f32 %v452_v52 }
 0x29e   :  { %v655_v55 = vpop.eup %654 }
 0x29f   :  { %v454_v57 = vmul.f32 %v655_v55, %v452_v52  ;;  %vm460_vm7 = vweird.f32 %v655_v55 }
 0x2a0   :  { %vm461_vm11 = vmor %vm459_vm9, %vm460_vm7 }
 0x2a1   :  { %v455_v58 = vmul.f32 %v655_v55, %v454_v57 }
 0x2a3   :  { %v456_v60 = vmul.f32 0.5, %v455_v58 }
 0x2a5   :  { %v457_v61 = vsub.f32 1.5, %v456_v60 }
 0x2a7   :  { %v458_v63 = vmul.f32 %v655_v55, %v457_v61 }
 0x2a9   :  { %v462_v0 = vsel %vm461_vm11, %v655_v55, %v458_v63 }
 0x2aa   :  { %v463_v2 = vmul.f32 %v462_v0, %v428_v47 }
 0x2ac   :  { %605 = vmatpush.xpose.msk.msrb.mxu2 %vm70_vm0, %v463_v2 }
 0x2af   :  { %606 = vmatmul.msk.f32.vlgmr.msrb.gmra.mxu2 %vm70_vm0, %v447_v3 }
 0x332   :  { %v493_v10 = vpop.f32.mrf.mxu2 }
 0x333   :  { %v497_v12 = vmul.f32 %v496_v7, %v493_v10 }
 0x335   :  { %v499_v14 = vadd.f32 %v498_v11, %v497_v12 }
 0x337   :  { %v507_v15 = vmul.f32 %v506_v13, %v499_v14 }
 0x339   :  { %v509_v16 = vand.u32 2147483647, %v507_v15  ;;  %v508_v31 = vmax.f32 %v507_v15, 0.0 }
 0x33b   :  { %v510_v17 = vsub.f32 0.0, %v509_v16 }
 0x33d   :  { %v511_v18 = vmul.f32 1.442695, %v510_v17 }
 0x33f   :  { %656 = vpow2.f32 %v511_v18 }
 0x345   :  { %v657_v19 = vpop.eup %656 }
 0x346   :  { %v513_v20 = vadd.f32 1.0, %v657_v19  ;;  %v516_v21 = vmul.f32 -0.5, %v657_v19  ;;  %v519_v25 = vand.u32 2147483647, %v657_v19 }
 0x348   :  { %658 = vlog2.f32 %v513_v20  ;;  %v517_v23 = vadd.f32 1.0, %v516_v21  ;;  %vm520_vm0 = vcmp.lt.f32.partialorder %v519_v25, 0.0004427343 }
 0x349   :  { %660 = vrcp.f32 %v708_v35 }
 0x34a   :  { %v518_v30 = vmul.f32 %v657_v19, %v517_v23 }
 0x34e   :  { %v659_v26 = vpop.eup %658 }
 0x34f   :  { %v515_v27 = vmul.f32 0.6931472, %v659_v26  ;;  %v661_v36 = vpop.eup %660 }
 0x350   :  { %v535_v39 = vmul.f32 2.0, %v661_v36  ;;  %vm539_vm15 = vweird.f32 %v661_v36 }
 0x351   :  { %v521_v32 = vsel %vm520_vm0, %v518_v30, %v515_v27 }
 0x352   :  { %v522_v33 = vadd.f32 %v521_v32, %v508_v31  ;;  %v536_v40 = vsub.f32 1.0, %v535_v39 }
 0x354   :  { %v524_v34 = vsel %vm523_vm14, %v522_v33, 0.0  ;;  %v537_v44 = vmul.f32 %v661_v36, %v536_v40 }
 0x355   :  { %525 = vadd.xlane.f32.xlu0 %v524_v34 }
 0x356   :  { %v538_v47 = vadd.f32 %v661_v36, %v537_v44 }
 0x358   :  { %v540_v28 = vsel %vm539_vm15, %v661_v36, %v538_v47 }
 0x3c8   :  { %v526_v41 = vpop.xlane.xlu0 %525 }
 0x3c9   :  { %v527_v42 = vrot.slane %v526_v41, 4 }
 0x3cb   :  { %v528_v43 = vadd.f32 %v527_v42, %v526_v41 }
 0x3cd   :  { %v529_v45 = vrot.slane %v528_v43, 2 }
 0x3cf   :  { %v530_v46 = vadd.f32 %v529_v45, %v528_v43 }
 0x3d1   :  { %v531_v48 = vrot.slane %v530_v46, 1 }
 0x3d3   :  { %v532_v22 = vadd.f32 %v531_v48, %v530_v46 }
 0x3d5   :  { %619 = vpush %v532_v22 }
 0x3d6   :  { %621 = vpush %v540_v28 }
 0x406   :  { %s620_s20 = spop %619 }
 0x407   :  { %s622_s6 = spop %621 }
 0x408   :  { %s542_s21 = smul.f32 %s622_s6, %s620_s20 }
 0x40a   :  { %544 = sst [smem:[#allocation7]] %s542_s21 }
 0x40b   :  { %564 = dma.smem_to_hbm %s709_s9, 16, %s562_s5, [#allocation6]  }
 0x40c   :  { %698 = dma.done.wait [#allocation5], 32  }
 0x40d   :  { %699 = vsyncadd [#allocation5], 4294967264 }
 0x40e   :  { %700 = dma.done.wait [#allocation6], 16  }
 0x40f   :  { %701 = vsyncadd [#allocation6], 4294967280 }
 0x410   :  { %573 = sfence }
 0x411   :  { %574 = vsyncpa [#allocation5], 1 }
 0x412   :  { %575 = vsyncpa [#allocation6], 1 }

// kernel: siglip_model_forward.6
= control target key start
LH: loop header
LB: loop body
LE: loop exit
PB: predicated region body
PF: predicated region fallthrough
CT: control target
= control target key end

     0   :  { %s1068_s25 = smov 0   ;;  %s1178_s0 = inlined_call_operand.vmem [shape: bf16[2,4,32], index: 0, kind: input, shape index: {}]   ;;  %s1179_s1 = inlined_call_operand.vmem [shape: f32[1,32], index: 1, kind: input, shape index: {}]   ;;  %s1180_s2 = inlined_call_operand.vmem [shape: f32[1,32], index: 2, kind: input, shape index: {}]   ;;  %s1181_s3 = inlined_call_operand.vmem [shape: bf16[32,96], index: 3, kind: input, shape index: {}]   ;;  %s1182_s4 = inlined_call_operand.vmem [shape: f32[1,96], index: 4, kind: input, shape index: {}]   ;;  %s1183_s5 = inlined_call_operand.vmem [shape: bf16[32,32], index: 5, kind: input, shape index: {}]   ;;  %s1184_s6 = inlined_call_operand.vmem [shape: f32[1,32], index: 6, kind: input, shape index: {}]   ;;  %s1185_s7 = inlined_call_operand.vmem [shape: f32[1,32], index: 7, kind: input, shape index: {}]   ;;  %s1186_s8 = inlined_call_operand.vmem [shape: f32[1,32], index: 8, kind: input, shape index: {}]   ;;  %s1187_s9 = inlined_call_operand.vmem [shape: bf16[32,64], index: 9, kind: input, shape index: {}]   ;;  %s1188_s10 = inlined_call_operand.vmem [shape: f32[1,64], index: 10, kind: input, shape index: {}]   ;;  %s1189_s11 = inlined_call_operand.vmem [shape: bf16[64,32], index: 11, kind: input, shape index: {}]   ;;  %s1190_s12 = inlined_call_operand.vmem [shape: f32[1,32], index: 12, kind: input, shape index: {}]   ;;  %s1191_s13 = inlined_call_operand.vmem [shape: bf16[2,4,32], index: 13, kind: output, shape index: {}]  }
   0x1 LB: > { %s878_s26 = sadd.s32 4294967295, %s990_s25   ;;  %p882_p0 = scmp.ge.s32.totalorder %s990_s25, 1  ;;  %s990_s25 = sphi %s1068_s25, %s23_s25  }
   0x2   : > { %p386_p1 = scmp.lt.s32.totalorder %s990_s25, 3 }
   0x4   : > { %p387_p2 = pnand %p882_p0, %p386_p1 }
   0x5   : > { %p428_p3 = scmp.lt.s32.totalorder (!%p387_p2), %s878_s26, 1  ;;  %s993_s24 = smov (!%p387_p2), 112  }
   0x6   : > { %390 = sbr.rel (%p387_p2) target bundleno = 1773 (0x6ed), region = 72  ;;  %s994_s28 = smov (!%p387_p2), 96  }
   0x7   : > { %s995_s29 = smov (!%p387_p2), 80   ;;  %s997_s14 = smov (!%p387_p2), 64  }
   0xb   : > { %s1193_s26 = smov (!%p428_p3, %s878_s26), 1  ;;  %vm441_vm0 = vcmask 257024   ;;  %v992_v3 = vmov 32.0   ;;  %v937_v15 = vld [vmem:[%s1181_s3 + $0x8] sm:$0xff]  ;;  %v936_v16 = vld [vmem:[%s1181_s3] sm:$0xff]  ;;  %vm500_vm5 = vcmask 261120  }
   0xc   : > { %s883_s27 = sshll.u32 %s1193_s26, 1  ;;  %968 = vrcp.f32 %v992_v3  ;;  %510 = vmatpush.bf16.msra.mxu0 %v937_v15  ;;  %v960_v26 = vld [vmem:[%s1179_s1] ss:$0 sm:$0xff]  ;;  %vm525_vm6 = vcmask 130048   ;;  %vm545_vm7 = vcmask 27648   ;;  %vm564_vm8 = vcmask 1041408  }
   0xd   : > { %s431_s30 = scalar_lea.vmem %s1178_s0, %s883_s27  ;;  %v961_v29 = vld [vmem:[%s1180_s2] ss:$0 sm:$0xff]  ;;  %vm560_vm9 = vcmask 31744   ;;  %vm804_vm13 = vcmask 523264   ;;  %s435_s15 = scalar_lea.vmem %s1191_s13, %s883_s27  ;;  %vm823_vm14 = vcmask 254976  }
   0xe   : > { %v437_v0 = vld [vmem:[%s431_s30] sm:$0x3]  ;;  %s996_s30 = smov 48  }
   0xf   : > { %v1084_v1 = vunpack.c.l.bf16 %v437_v0  ;;  %v962_v33 = vld [vmem:[%s1182_s4] ss:$0 sm:$0xff] }
  0x10   : > { %511 = vmatpush.bf16.msra.mxu0 %v936_v16 }
  0x11   : > { %v442_v2 = vsel %vm441_vm0, %v1084_v1, 0.0 }
  0x12   : > { %443 = vadd.xlane.f32.xlu0 %v442_v2  ;;  %v969_v4 = vpop.eup %968 }
  0x13   : > { %v446_v5 = vmul.f32 32.0, %v969_v4  ;;  %vm450_vm1 = vweird.f32 %v969_v4 }
  0x15   : > { %v447_v6 = vsub.f32 1.0, %v446_v5 }
  0x17   : > { %v448_v7 = vmul.f32 %v969_v4, %v447_v6 }
  0x19   : > { %v449_v8 = vadd.f32 %v969_v4, %v448_v7 }
  0x1b   : > { %v1088_v9 = vsel %vm450_vm1, %v969_v4, %v449_v8  ;;  %v938_v8 = vld [vmem:[%s1183_s5] sm:$0xff] }
  0x85   : > { %v444_v10 = vpop.xlane.xlu0 %443 }
  0x86   : > { %v452_v11 = vmul.f32 %v1088_v9, %v444_v10  ;;  %v939_v10 = vld [vmem:[%s1183_s5 + $0x8] sm:$0xff] }
  0x87   : > { %655 = vmatpush.bf16.msrb.mxu0 %v939_v10 }
  0x88   : > { %v453_v12 = vsub.f32 %v1084_v1, %v452_v11 }
  0x8a   : > { %v454_v13 = vmul.f32 %v453_v12, %v453_v12 }
  0x8c   : > { %v455_v14 = vsel %vm441_vm0, %v454_v13, 0.0 }
  0x8d   : > { %456 = vadd.xlane.f32.xlu0 %v455_v14 }
 0x100   : > { %v457_v17 = vpop.xlane.xlu0 %456 }
 0x101   : > { %v458_v18 = vmul.f32 %v457_v17, %v1088_v9 }
 0x103   : > { %v459_v19 = vadd.f32 1e-06, %v458_v18 }
 0x105   : > { %970 = vrsqrt.f32 %v459_v19  ;;  %vm466_vm3 = vweird.f32 %v459_v19 }
 0x10b   : > { %v971_v20 = vpop.eup %970 }
 0x10c   : > { %v461_v21 = vmul.f32 %v971_v20, %v459_v19  ;;  %vm467_vm2 = vweird.f32 %v971_v20 }
 0x10d   : > { %vm468_vm4 = vmor %vm466_vm3, %vm467_vm2 }
 0x10e   : > { %v462_v22 = vmul.f32 %v971_v20, %v461_v21  ;;  %v963_v21 = vld [vmem:[%s1184_s6] ss:$0 sm:$0xff] }
 0x110   : > { %v463_v23 = vmul.f32 0.5, %v462_v22 }
 0x112   : > { %v464_v24 = vsub.f32 1.5, %v463_v23 }
 0x114   : > { %v465_v25 = vmul.f32 %v971_v20, %v464_v24 }
 0x116   : > { %v469_v27 = vsel %vm468_vm4, %v971_v20, %v465_v25 }
 0x117   : > { %v470_v28 = vmul.f32 %v469_v27, %v453_v12 }
 0x119   : > { %v474_v30 = vmul.f32 %v960_v26, %v470_v28 }
 0x11b   : > { %v478_v31 = vadd.f32 %v961_v29, %v474_v30 }
 0x11d   : > { %v479_v32 = vpack.c.bf16 %v478_v31, %v478_v31  ;;  %v940_v31 = vld [vmem:[%s1187_s9] sm:$0xff] }
 0x11f   : > { %893 = vmatmul.msk.bf16.vlgmr.msra.gmra.mxu0 %vm500_vm5, %v479_v32 }
 0x19c   : > { %v513_v34 = vpop.f32.mrf.mxu0 }
 0x19d   : > { %v514_v35 = vadd.f32 %v962_v33, %v513_v34 }
 0x19f   : > { %v521_v36 = vpack.c.bf16 %v514_v35, %v514_v35 }
 0x1a1   : > { %582 = vrot.lane.b32.xlu2 %v521_v36, %s993_s24  ;;  %523 = vrot.lane.b32.xlu1 %v521_v36, %s994_s28 }
 0x1a4   : > { %v515_v37 = vpop.f32.mrf.mxu0 }
 0x1a9   : > { %584 = vrot.lane.b32.xlu1 %v521_v36, %s995_s29 }
 0x1fb   : > { %v583_v42 = vpop.permute.xlu2 %582 }
 0x213   : > { %v524_v38 = vpop.permute.xlu1 %523 }
 0x214   : > { %v530_v39 = vsel %vm525_vm6, %v524_v38, 0 }
 0x215   : > { %539 = vmatpush.bf16.xpose.msra.mxu1 %v530_v39 }
 0x21b   : > { %v585_v40 = vpop.permute.xlu1 %584 }
 0x21c   : > { %894 = vmatmul.msk.bf16.vlgmr.msra.gmra.mxu1 %vm525_vm6, %v521_v36  ;;  %v590_v41 = vsel %vm525_vm6, %v585_v40, 0 }
 0x21d   : > { %599 = vmatpush.bf16.xpose.msra.mxu3 %v590_v41  ;;  %677 = vmatpush.bf16.msrb.mxu1 %v938_v8  ;;  %v964_v41 = vld [vmem:[%s1185_s7] ss:$0 sm:$0xff] }
 0x224   : > { %896 = vmatmul.msk.bf16.vlgmr.msra.gmra.mxu3 %vm525_vm6, %v583_v42 }
 0x299   : > { %v541_v43 = vpop.f32.mrf.mxu1 }
 0x29a   : > { %v546_v44 = vsel %vm545_vm7, %v541_v43, -inf }
 0x29b   : > { %547 = vmax.xlane.f32.xlu2 %v546_v44 }
 0x2a1   : > { %v543_v45 = vpop.f32.mrf.mxu1 }
 0x2a7   : > { %v601_v46 = vpop.f32.mrf.mxu3 }
 0x2a8   : > { %v605_v47 = vsel %vm545_vm7, %v601_v46, -inf }
 0x2a9   : > { %606 = vmax.xlane.f32.xlu0 %v605_v47  ;;  %v945_v47 = vld [vmem:[%s1189_s11 + $0x18] sm:$0xff] }
 0x2af   : > { %v603_v48 = vpop.f32.mrf.mxu3 }
 0x2b0   : > { %v944_v48 = vld [vmem:[%s1189_s11 + $0x10] sm:$0xff] }
 0x2b3   : > { %617 = vrot.lane.b32.xlu2 %v521_v36, %s996_s30 }
 0x2bd   : > { %558 = vrot.lane.b32.xlu0 %v521_v36, %s997_s14 }
 0x30e   : > { %v548_v49 = vpop.xlane.xlu2 %547 }
 0x30f   : > { %v549_v50 = vsub.f32 %v541_v43, %v548_v49  ;;  %v943_v49 = vld [vmem:[%s1189_s11 + $0x8] sm:$0xff] }
 0x311   : > { %v550_v51 = vmul.f32 1.442695, %v549_v50  ;;  %v942_v50 = vld [vmem:[%s1189_s11] sm:$0xff] }
 0x313   : > { %972 = vpow2.f32 %v550_v51  ;;  %v966_v51 = vld [vmem:[%s1188_s10] ss:$0 sm:$0xff] }
 0x316   : > { %v618_v59 = vpop.permute.xlu2 %617 }
 0x317   : > { %v623_v62 = vsel %vm564_vm8, %v618_v59, 0 }
 0x319   : > { %v973_v52 = vpop.eup %972 }
 0x31a   : > { %v552_v53 = vsel %vm545_vm7, %v973_v52, 0.0 }
 0x31b   : > { %553 = vadd.xlane.f32.xlu1 %v552_v53 }
 0x31c   : > { %v607_v54 = vpop.xlane.xlu0 %606 }
 0x31d   : > { %v608_v55 = vsub.f32 %v601_v46, %v607_v54 }
 0x31f   : > { %v609_v56 = vmul.f32 1.442695, %v608_v55 }
 0x321   : > { %974 = vpow2.f32 %v609_v56 }
 0x327   : > { %v975_v57 = vpop.eup %974 }
 0x328   : > { %v611_v58 = vsel %vm545_vm7, %v975_v57, 0.0 }
 0x329   : > { %612 = vadd.xlane.f32.xlu0 %v611_v58 }
 0x32f   : > { %v559_v60 = vpop.permute.xlu0 %558 }
 0x330   : > { %v566_v61 = vsel %vm564_vm8, %v559_v60, 0 }
 0x331   : > { %575 = vmatpush.bf16.msra.mxu2 %v566_v61 }
 0x335   : > { %632 = vmatpush.bf16.msrb.mxu2 %v623_v62 }
 0x38e   : > { %v554_v63 = vpop.xlane.xlu1 %553 }
 0x38f   : > { %976 = vrcp.f32 %v554_v63 }
 0x395   : > { %v977_v0 = vpop.eup %976 }
 0x396   : > { %v556_v2 = vmul.f32 %v977_v0, %v973_v52 }
 0x398   : > { %v557_v3 = vpack.c.bf16 %v556_v2, %v556_v2  ;;  %v967_v2 = vld [vmem:[%s1190_s12] ss:$0 sm:$0xff] }
 0x39a   : > { %895 = vmatmul.msk.bf16.vlgmr.msra.gmra.mxu2 %vm560_vm9, %v557_v3 }
 0x39b   : > { %812 = vmatpush.bf16.msra.mxu2 %v945_v47 }
 0x39c   : > { %v613_v4 = vpop.xlane.xlu0 %612 }
 0x39d   : > { %978 = vrcp.f32 %v613_v4 }
 0x39f   : > { %813 = vmatpush.bf16.msra.mxu2 %v944_v48 }
 0x3a3   : > { %v979_v5 = vpop.eup %978  ;;  %814 = vmatpush.bf16.msra.mxu2 %v943_v49 }
 0x3a4   : > { %v615_v6 = vmul.f32 %v979_v5, %v975_v57 }
 0x3a6   : > { %v616_v7 = vpack.c.bf16 %v615_v6, %v615_v6 }
 0x3a7   : > { %815 = vmatpush.bf16.msra.mxu2 %v942_v50 }
 0x3aa   : > { %897 = vmatmul.msk.bf16.vlgmr.msrb.gmra.mxu2 %vm560_vm9, %v616_v7 }
 0x41d   : > { %v577_v11 = vpop.f32.mrf.mxu2 }
 0x41e   : > { %v581_v12 = vpack.c.bf16 %v577_v11, %v577_v11 }
 0x420   : > { %907 = vmatmul.msk.bf16.vlgmr.msrb.gmra.mxu1 %vm525_vm6, %v581_v12 }
 0x425   : > { %v579_v13 = vpop.f32.mrf.mxu2 }
 0x42d   : > { %v634_v14 = vpop.f32.mrf.mxu2 }
 0x42e   : > { %v638_v15 = vpack.c.bf16 %v634_v14, %v634_v14 }
 0x430   : > { %902 = vmatmul.msk.bf16.vlgmr.msrb.gmra.mxu0 %vm525_vm6, %v638_v15 }
 0x435   : > { %v636_v16 = vpop.f32.mrf.mxu2 }
 0x49d   : > { %v679_v17 = vpop.f32.mrf.mxu1 }
 0x4a5   : > { %v681_v18 = vpop.f32.mrf.mxu1 }
 0x4ad   : > { %v657_v19 = vpop.f32.mrf.mxu0 }
 0x4ae   : > { %v680_v20 = vadd.f32 %v679_v17, %v657_v19 }
 0x4b0   : > { %v683_v22 = vadd.f32 %v680_v20, %v1084_v1  ;;  %v941_v1 = vld [vmem:[%s1187_s9 + $0x8] sm:$0xff] }
 0x4b1   : > { %751 = vmatpush.bf16.msrb.mxu3 %v941_v1 }
 0x4b2   : > { %v1130_v23 = vadd.f32 %v963_v21, %v683_v22 }
 0x4b4   : > { %v691_v24 = vsel %vm441_vm0, %v1130_v23, 0.0 }
 0x4b5   : > { %692 = vadd.xlane.f32.xlu1 %v691_v24  ;;  %v659_v25 = vpop.f32.mrf.mxu0  ;;  %752 = vmatpush.bf16.msrb.mxu3 %v940_v31 }
 0x528   : > { %v693_v26 = vpop.xlane.xlu1 %692 }
 0x529   : > { %v694_v27 = vmul.f32 %v693_v26, %v1088_v9 }
 0x52b   : > { %v695_v28 = vsub.f32 %v1130_v23, %v694_v27 }
 0x52d   : > { %v696_v29 = vmul.f32 %v695_v28, %v695_v28 }
 0x52f   : > { %v697_v30 = vsel %vm441_vm0, %v696_v29, 0.0 }
 0x530   : > { %698 = vadd.xlane.f32.xlu1 %v697_v30 }
 0x5a3   : > { %v699_v32 = vpop.xlane.xlu1 %698 }
 0x5a4   : > { %v700_v33 = vmul.f32 %v699_v32, %v1088_v9  ;;  %v965_v9 = vld [vmem:[%s1186_s8] ss:$0 sm:$0xff] }
 0x5a6   : > { %v701_v34 = vadd.f32 1e-06, %v700_v33 }
 0x5a8   : > { %980 = vrsqrt.f32 %v701_v34  ;;  %vm708_vm11 = vweird.f32 %v701_v34 }
 0x5ae   : > { %v981_v35 = vpop.eup %980 }
 0x5af   : > { %v703_v36 = vmul.f32 %v981_v35, %v701_v34  ;;  %vm709_vm10 = vweird.f32 %v981_v35 }
 0x5b0   : > { %vm710_vm12 = vmor %vm708_vm11, %vm709_vm10 }
 0x5b1   : > { %v704_v37 = vmul.f32 %v981_v35, %v703_v36 }
 0x5b3   : > { %v705_v38 = vmul.f32 0.5, %v704_v37 }
 0x5b5   : > { %v706_v39 = vsub.f32 1.5, %v705_v38 }
 0x5b7   : > { %v707_v40 = vmul.f32 %v981_v35, %v706_v39 }
 0x5b9   : > { %v711_v42 = vsel %vm710_vm12, %v981_v35, %v707_v40 }
 0x5ba   : > { %v712_v43 = vmul.f32 %v711_v42, %v695_v28 }
 0x5bc   : > { %v716_v44 = vmul.f32 %v964_v41, %v712_v43 }
 0x5be   : > { %v720_v45 = vadd.f32 %v965_v9, %v716_v44 }
 0x5c0   : > { %v721_v46 = vpack.c.bf16 %v720_v45, %v720_v45 }
 0x5c2   : > { %916 = vmatmul.msk.bf16.vlgmr.msrb.gmra.mxu3 %vm500_vm5, %v721_v46 }
 0x645   : > { %v754_v52 = vpop.f32.mrf.mxu3 }
 0x646   : > { %v755_v53 = vadd.f32 %v966_v51, %v754_v52 }
 0x648   : > { %v758_v54 = vmul.f32 %v755_v53, %v755_v53 }
 0x64a   : > { %v759_v55 = vmul.f32 %v758_v54, %v755_v53 }
 0x64c   : > { %v760_v56 = vmul.f32 0.044715, %v759_v55 }
 0x64d   : > { %v756_v57 = vpop.f32.mrf.mxu3 }
 0x64e   : > { %v761_v58 = vadd.f32 %v760_v56, %v755_v53 }
 0x650   : > { %v762_v59 = vmul.f32 0.7978846, %v761_v58 }
 0x652   : > { %982 = vtanh.f32 %v762_v59 }
 0x658   : > { %v983_v60 = vpop.eup %982 }
 0x659   : > { %v764_v61 = vadd.f32 1.0, %v983_v60 }
 0x65b   : > { %v765_v62 = vmul.f32 0.5, %v764_v61 }
 0x65d   : > { %v766_v63 = vmul.f32 %v765_v62, %v755_v53 }
 0x65f   : > { %v767_v0 = vpack.c.bf16 %v766_v63, %v766_v63 }
 0x661   : > { %933 = vmatmul.msk.bf16.vlgmr.msra.gmra.mxu2 %vm804_vm13, %v767_v0 }
 0x6e4   : > { %v817_v3 = vpop.f32.mrf.mxu2 }
 0x6e5   : > { %v818_v4 = vadd.f32 %v967_v2, %v817_v3 }
 0x6e7   : > { %v821_v5 = vadd.f32 %v818_v4, %v1130_v23 }
 0x6e9   : > { %v822_v6 = vpack.c.bf16 %v821_v5, %v821_v5 }
 0x6eb   : > { %824 = vst.msk [vmem:[%s435_s15] sm:$0x3] %vm823_vm14, %v822_v6 }
 0x6ec   : > { %v819_v7 = vpop.f32.mrf.mxu2 }
 0x6ed PF: > { %s23_s25 = sadd.s32 1, %s990_s25  }
 0x6ee   : > { %p20_p4 = scmp.ge.s32.totalorder %s23_s25, 4  }
 0x6f0   :  { %22 = sbr.rel (!%p20_p4) target bundleno = 1 (0x1), region = 102 }

// kernel: siglip_model_forward.8
= control target key start
LH: loop header
LB: loop body
LE: loop exit
PB: predicated region body
PF: predicated region fallthrough
CT: control target
= control target key end

     0   :  { %s1126_s29 = smov 0   ;;  %s1242_s0 = inlined_call_operand.vmem [shape: bf16[2,8,32], index: 0, kind: input, shape index: {}]   ;;  %s1243_s1 = inlined_call_operand.vmem [shape: f32[2,1,8], index: 1, kind: input, shape index: {}]   ;;  %s1244_s2 = inlined_call_operand.vmem [shape: f32[1,32], index: 2, kind: input, shape index: {}]   ;;  %s1245_s3 = inlined_call_operand.vmem [shape: f32[1,32], index: 3, kind: input, shape index: {}]   ;;  %s1246_s4 = inlined_call_operand.vmem [shape: bf16[32,96], index: 4, kind: input, shape index: {}]   ;;  %s1247_s5 = inlined_call_operand.vmem [shape: f32[1,96], index: 5, kind: input, shape index: {}]   ;;  %s1248_s6 = inlined_call_operand.vmem [shape: bf16[32,32], index: 6, kind: input, shape index: {}]   ;;  %s1249_s7 = inlined_call_operand.vmem [shape: f32[1,32], index: 7, kind: input, shape index: {}]   ;;  %s1250_s8 = inlined_call_operand.vmem [shape: f32[1,32], index: 8, kind: input, shape index: {}]   ;;  %s1251_s9 = inlined_call_operand.vmem [shape: f32[1,32], index: 9, kind: input, shape index: {}]   ;;  %s1252_s10 = inlined_call_operand.vmem [shape: bf16[32,64], index: 10, kind: input, shape index: {}]   ;;  %s1253_s11 = inlined_call_operand.vmem [shape: f32[1,64], index: 11, kind: input, shape index: {}]   ;;  %s1254_s12 = inlined_call_operand.vmem [shape: bf16[64,32], index: 12, kind: input, shape index: {}]   ;;  %s1255_s13 = inlined_call_operand.vmem [shape: f32[1,32], index: 13, kind: input, shape index: {}]   ;;  %s1256_s14 = inlined_call_operand.vmem [shape: bf16[2,8,32], index: 14, kind: output, shape index: {}]  }
   0x1 LB: > { %s930_s30 = sadd.s32 4294967295, %s1043_s29   ;;  %p934_p0 = scmp.ge.s32.totalorder %s1043_s29, 1  ;;  %s1043_s29 = sphi %s1126_s29, %s24_s29  }
   0x2   : > { %p419_p1 = scmp.lt.s32.totalorder %s1043_s29, 3 }
   0x4   : > { %p420_p2 = pnand %p934_p0, %p419_p1 }
   0x5   : > { %p466_p3 = scmp.lt.s32.totalorder (!%p420_p2), %s930_s30, 1  ;;  %s1046_s16 = smov (!%p420_p2), 112  }
   0x6   : > { %423 = sbr.rel (%p420_p2) target bundleno = 1775 (0x6ef), region = 76  ;;  %s1047_s17 = smov (!%p420_p2), 96  }
   0x7   : > { %s1048_s21 = smov (!%p420_p2), 80   ;;  %s1049_s22 = smov (!%p420_p2), 48  }
   0x8   : > { %s1050_s23 = smov (!%p420_p2), 64  }
   0xb   : > { %s1258_s30 = smov (!%p466_p3, %s930_s30), 1  ;;  %vm482_vm0 = vcmask 261120   ;;  %v1045_v3 = vmov 32.0   ;;  %v989_v15 = vld [vmem:[%s1246_s4 + $0x8] sm:$0xff]  ;;  %v988_v16 = vld [vmem:[%s1246_s4] sm:$0xff]  ;;  %vm569_vm5 = vcmask 130048  }
   0xc   : > { %s935_s15 = sshll.u32 %s1258_s30, 2  ;;  %1021 = vrcp.f32 %v1045_v3  ;;  %550 = vmatpush.bf16.msra.mxu0 %v989_v15  ;;  %v1012_v26 = vld [vmem:[%s1244_s2] ss:$0 sm:$0xff]  ;;  %s472_s20 = scalar_lea.vmem %s1243_s1, %s1258_s30  ;;  %vm589_vm6 = vcmask 64512   ;;  %vm607_vm7 = vcmask 1043456   ;;  %vm847_vm11 = vcmask 523264  }
   0xd   : > { %s469_s18 = scalar_lea.vmem %s1242_s0, %s935_s15  ;;  %v1013_v29 = vld [vmem:[%s1245_s3] ss:$0 sm:$0xff]  ;;  %s476_s26 = scalar_lea.vmem %s1256_s14, %s935_s15  ;;  %vm866_vm12 = vcmask 257024  }
   0xe   : > { %v478_v0 = vld [vmem:[%s469_s18] sm:$0xf] }
   0xf   : > { %v1142_v1 = vunpack.c.l.bf16 %v478_v0  ;;  %v1014_v33 = vld [vmem:[%s1247_s5] ss:$0 sm:$0xff] }
  0x10   : > { %551 = vmatpush.bf16.msra.mxu0 %v988_v16  ;;  %v1015_v43 = vld [vmem:[%s472_s20] ss:$0 sm:$0xff] }
  0x11   : > { %v483_v2 = vsel %vm482_vm0, %v1142_v1, 0.0 }
  0x12   : > { %484 = vadd.xlane.f32.xlu0 %v483_v2  ;;  %v1022_v4 = vpop.eup %1021 }
  0x13   : > { %v487_v5 = vmul.f32 32.0, %v1022_v4  ;;  %vm491_vm1 = vweird.f32 %v1022_v4 }
  0x15   : > { %v488_v6 = vsub.f32 1.0, %v487_v5 }
  0x17   : > { %v489_v7 = vmul.f32 %v1022_v4, %v488_v6 }
  0x19   : > { %v490_v8 = vadd.f32 %v1022_v4, %v489_v7 }
  0x1b   : > { %v1146_v9 = vsel %vm491_vm1, %v1022_v4, %v490_v8 }
  0x85   : > { %v485_v10 = vpop.xlane.xlu0 %484 }
  0x86   : > { %v493_v11 = vmul.f32 %v1146_v9, %v485_v10 }
  0x88   : > { %v494_v12 = vsub.f32 %v1142_v1, %v493_v11 }
  0x8a   : > { %v495_v13 = vmul.f32 %v494_v12, %v494_v12 }
  0x8c   : > { %v496_v14 = vsel %vm482_vm0, %v495_v13, 0.0  ;;  %v991_v13 = vld [vmem:[%s1248_s6 + $0x8] sm:$0xff] }
  0x8d   : > { %497 = vadd.xlane.f32.xlu0 %v496_v14  ;;  %698 = vmatpush.bf16.msrb.mxu0 %v991_v13 }
 0x100   : > { %v498_v17 = vpop.xlane.xlu0 %497 }
 0x101   : > { %v499_v18 = vmul.f32 %v498_v17, %v1146_v9 }
 0x103   : > { %v500_v19 = vadd.f32 1e-06, %v499_v18 }
 0x105   : > { %1023 = vrsqrt.f32 %v500_v19  ;;  %vm507_vm3 = vweird.f32 %v500_v19 }
 0x10b   : > { %v1024_v20 = vpop.eup %1023 }
 0x10c   : > { %v502_v21 = vmul.f32 %v1024_v20, %v500_v19  ;;  %vm508_vm2 = vweird.f32 %v1024_v20 }
 0x10d   : > { %vm509_vm4 = vmor %vm507_vm3, %vm508_vm2 }
 0x10e   : > { %v503_v22 = vmul.f32 %v1024_v20, %v502_v21 }
 0x110   : > { %v504_v23 = vmul.f32 0.5, %v503_v22 }
 0x112   : > { %v505_v24 = vsub.f32 1.5, %v504_v23 }
 0x114   : > { %v506_v25 = vmul.f32 %v1024_v20, %v505_v24  ;;  %v1016_v24 = vld [vmem:[%s1249_s7] ss:$0 sm:$0xff] }
 0x116   : > { %v510_v27 = vsel %vm509_vm4, %v1024_v20, %v506_v25 }
 0x117   : > { %v511_v28 = vmul.f32 %v510_v27, %v494_v12  ;;  %v990_v12 = vld [vmem:[%s1248_s6] sm:$0xff] }
 0x119   : > { %v515_v30 = vmul.f32 %v1012_v26, %v511_v28 }
 0x11b   : > { %v519_v31 = vadd.f32 %v1013_v29, %v515_v30 }
 0x11d   : > { %v520_v32 = vpack.c.bf16 %v519_v31, %v519_v31 }
 0x11f   : > { %945 = vmatmul.msk.bf16.vlgmr.msra.gmra.mxu0 %vm482_vm0, %v520_v32 }
 0x19c   : > { %v553_v34 = vpop.f32.mrf.mxu0 }
 0x19d   : > { %v554_v35 = vadd.f32 %v1014_v33, %v553_v34  ;;  %v992_v34 = vld [vmem:[%s1252_s10] sm:$0xff] }
 0x19f   : > { %v565_v36 = vpack.c.bf16 %v554_v35, %v554_v35 }
 0x1a1   : > { %625 = vrot.lane.b32.xlu2 %v565_v36, %s1046_s16  ;;  %567 = vrot.lane.b32.xlu1 %v565_v36, %s1047_s17 }
 0x1a4   : > { %v555_v37 = vpop.f32.mrf.mxu0 }
 0x1a9   : > { %627 = vrot.lane.b32.xlu1 %v565_v36, %s1048_s21 }
 0x1fb   : > { %v626_v42 = vpop.permute.xlu2 %625 }
 0x213   : > { %v568_v38 = vpop.permute.xlu1 %567 }
 0x214   : > { %v574_v39 = vsel %vm569_vm5, %v568_v38, 0 }
 0x215   : > { %583 = vmatpush.bf16.xpose.msra.mxu1 %v574_v39 }
 0x21b   : > { %v628_v40 = vpop.permute.xlu1 %627 }
 0x21c   : > { %946 = vmatmul.msk.bf16.vlgmr.msra.gmra.mxu1 %vm569_vm5, %v565_v36  ;;  %v633_v41 = vsel %vm569_vm5, %v628_v40, 0 }
 0x21d   : > { %642 = vmatpush.bf16.xpose.msra.mxu3 %v633_v41  ;;  %720 = vmatpush.bf16.msrb.mxu1 %v990_v12 }
 0x224   : > { %948 = vmatmul.msk.bf16.vlgmr.msra.gmra.mxu3 %vm569_vm5, %v626_v42 }
 0x299   : > { %v585_v44 = vpop.f32.mrf.mxu1 }
 0x29a   : > { %v586_v45 = vadd.f32 %v1015_v43, %v585_v44  ;;  %v1017_v44 = vld [vmem:[%s1250_s8] ss:$0 sm:$0xff] }
 0x29c   : > { %v590_v46 = vsel %vm589_vm6, %v586_v45, -inf }
 0x29d   : > { %591 = vmax.xlane.f32.xlu2 %v590_v46 }
 0x2a1   : > { %v587_v47 = vpop.f32.mrf.mxu1 }
 0x2a7   : > { %v644_v48 = vpop.f32.mrf.mxu3 }
 0x2a8   : > { %v645_v49 = vadd.f32 %v1015_v43, %v644_v48 }
 0x2aa   : > { %v648_v50 = vsel %vm589_vm6, %v645_v49, -inf }
 0x2ab   : > { %649 = vmax.xlane.f32.xlu0 %v648_v50  ;;  %v997_v50 = vld [vmem:[%s1254_s12 + $0x18] sm:$0xff] }
 0x2af   : > { %v646_v51 = vpop.f32.mrf.mxu3 }
 0x2b0   : > { %v996_v51 = vld [vmem:[%s1254_s12 + $0x10] sm:$0xff] }
 0x2b5   : > { %660 = vrot.lane.b32.xlu2 %v565_v36, %s1049_s22 }
 0x2bf   : > { %602 = vrot.lane.b32.xlu0 %v565_v36, %s1050_s23 }
 0x310   : > { %v592_v52 = vpop.xlane.xlu2 %591 }
 0x311   : > { %v593_v53 = vsub.f32 %v586_v45, %v592_v52  ;;  %v995_v52 = vld [vmem:[%s1254_s12 + $0x8] sm:$0xff] }
 0x313   : > { %v594_v54 = vmul.f32 1.442695, %v593_v53  ;;  %v994_v53 = vld [vmem:[%s1254_s12] sm:$0xff] }
 0x315   : > { %1025 = vpow2.f32 %v594_v54  ;;  %v1019_v54 = vld [vmem:[%s1253_s11] ss:$0 sm:$0xff] }
 0x318   : > { %v661_v62 = vpop.permute.xlu2 %660 }
 0x319   : > { %v666_v2 = vsel %vm607_vm7, %v661_v62, 0 }
 0x31b   : > { %v1026_v55 = vpop.eup %1025 }
 0x31c   : > { %v596_v56 = vsel %vm589_vm6, %v1026_v55, 0.0 }
 0x31d   : > { %597 = vadd.xlane.f32.xlu1 %v596_v56 }
 0x31e   : > { %v650_v57 = vpop.xlane.xlu0 %649 }
 0x31f   : > { %v651_v58 = vsub.f32 %v645_v49, %v650_v57 }
 0x321   : > { %v652_v59 = vmul.f32 1.442695, %v651_v58 }
 0x323   : > { %1027 = vpow2.f32 %v652_v59 }
 0x329   : > { %v1028_v60 = vpop.eup %1027 }
 0x32a   : > { %v654_v61 = vsel %vm589_vm6, %v1028_v60, 0.0 }
 0x32b   : > { %655 = vadd.xlane.f32.xlu0 %v654_v61 }
 0x331   : > { %v603_v63 = vpop.permute.xlu0 %602 }
 0x332   : > { %v609_v0 = vsel %vm607_vm7, %v603_v63, 0 }
 0x333   : > { %618 = vmatpush.bf16.msra.mxu2 %v609_v0 }
 0x337   : > { %675 = vmatpush.bf16.msrb.mxu2 %v666_v2 }
 0x390   : > { %v598_v3 = vpop.xlane.xlu1 %597 }
 0x391   : > { %1029 = vrcp.f32 %v598_v3 }
 0x397   : > { %v1030_v4 = vpop.eup %1029 }
 0x398   : > { %v600_v5 = vmul.f32 %v1030_v4, %v1026_v55 }
 0x39a   : > { %v601_v6 = vpack.c.bf16 %v600_v5, %v600_v5  ;;  %v1020_v5 = vld [vmem:[%s1255_s13] ss:$0 sm:$0xff] }
 0x39c   : > { %947 = vmatmul.msk.bf16.vlgmr.msra.gmra.mxu2 %vm589_vm6, %v601_v6 }
 0x39d   : > { %855 = vmatpush.bf16.msra.mxu2 %v997_v50 }
 0x39e   : > { %v656_v7 = vpop.xlane.xlu0 %655 }
 0x39f   : > { %1031 = vrcp.f32 %v656_v7 }
 0x3a1   : > { %856 = vmatpush.bf16.msra.mxu2 %v996_v51 }
 0x3a5   : > { %v1032_v8 = vpop.eup %1031  ;;  %857 = vmatpush.bf16.msra.mxu2 %v995_v52 }
 0x3a6   : > { %v658_v10 = vmul.f32 %v1032_v8, %v1028_v60 }
 0x3a8   : > { %v659_v11 = vpack.c.bf16 %v658_v10, %v658_v10 }
 0x3a9   : > { %858 = vmatpush.bf16.msra.mxu2 %v994_v53 }
 0x3ac   : > { %949 = vmatmul.msk.bf16.vlgmr.msrb.gmra.mxu2 %vm589_vm6, %v659_v11 }
 0x41f   : > { %v620_v14 = vpop.f32.mrf.mxu2 }
 0x420   : > { %v624_v15 = vpack.c.bf16 %v620_v14, %v620_v14 }
 0x422   : > { %959 = vmatmul.msk.bf16.vlgmr.msrb.gmra.mxu1 %vm569_vm5, %v624_v15 }
 0x427   : > { %v622_v16 = vpop.f32.mrf.mxu2 }
 0x42f   : > { %v677_v17 = vpop.f32.mrf.mxu2 }
 0x430   : > { %v681_v18 = vpack.c.bf16 %v677_v17, %v677_v17 }
 0x432   : > { %954 = vmatmul.msk.bf16.vlgmr.msrb.gmra.mxu0 %vm569_vm5, %v681_v18 }
 0x437   : > { %v679_v19 = vpop.f32.mrf.mxu2 }
 0x49f   : > { %v722_v20 = vpop.f32.mrf.mxu1 }
 0x4a7   : > { %v724_v21 = vpop.f32.mrf.mxu1 }
 0x4af   : > { %v700_v22 = vpop.f32.mrf.mxu0 }
 0x4b0   : > { %v723_v23 = vadd.f32 %v722_v20, %v700_v22 }
 0x4b2   : > { %v726_v25 = vadd.f32 %v723_v23, %v1142_v1  ;;  %v993_v1 = vld [vmem:[%s1252_s10 + $0x8] sm:$0xff] }
 0x4b3   : > { %794 = vmatpush.bf16.msrb.mxu3 %v993_v1 }
 0x4b4   : > { %v1194_v26 = vadd.f32 %v1016_v24, %v726_v25 }
 0x4b6   : > { %v734_v27 = vsel %vm482_vm0, %v1194_v26, 0.0 }
 0x4b7   : > { %735 = vadd.xlane.f32.xlu1 %v734_v27  ;;  %v702_v28 = vpop.f32.mrf.mxu0  ;;  %795 = vmatpush.bf16.msrb.mxu3 %v992_v34 }
 0x52a   : > { %v736_v29 = vpop.xlane.xlu1 %735 }
 0x52b   : > { %v737_v30 = vmul.f32 %v736_v29, %v1146_v9 }
 0x52d   : > { %v738_v31 = vsub.f32 %v1194_v26, %v737_v30 }
 0x52f   : > { %v739_v32 = vmul.f32 %v738_v31, %v738_v31 }
 0x531   : > { %v740_v33 = vsel %vm482_vm0, %v739_v32, 0.0 }
 0x532   : > { %741 = vadd.xlane.f32.xlu1 %v740_v33 }
 0x5a5   : > { %v742_v35 = vpop.xlane.xlu1 %741 }
 0x5a6   : > { %v743_v36 = vmul.f32 %v742_v35, %v1146_v9  ;;  %v1018_v9 = vld [vmem:[%s1251_s9] ss:$0 sm:$0xff] }
 0x5a8   : > { %v744_v37 = vadd.f32 1e-06, %v743_v36 }
 0x5aa   : > { %1033 = vrsqrt.f32 %v744_v37  ;;  %vm751_vm9 = vweird.f32 %v744_v37 }
 0x5b0   : > { %v1034_v38 = vpop.eup %1033 }
 0x5b1   : > { %v746_v39 = vmul.f32 %v1034_v38, %v744_v37  ;;  %vm752_vm8 = vweird.f32 %v1034_v38 }
 0x5b2   : > { %vm753_vm10 = vmor %vm751_vm9, %vm752_vm8 }
 0x5b3   : > { %v747_v40 = vmul.f32 %v1034_v38, %v746_v39 }
 0x5b5   : > { %v748_v41 = vmul.f32 0.5, %v747_v40 }
 0x5b7   : > { %v749_v42 = vsub.f32 1.5, %v748_v41 }
 0x5b9   : > { %v750_v43 = vmul.f32 %v1034_v38, %v749_v42 }
 0x5bb   : > { %v754_v45 = vsel %vm753_vm10, %v1034_v38, %v750_v43 }
 0x5bc   : > { %v755_v46 = vmul.f32 %v754_v45, %v738_v31 }
 0x5be   : > { %v759_v47 = vmul.f32 %v1017_v44, %v755_v46 }
 0x5c0   : > { %v763_v48 = vadd.f32 %v1018_v9, %v759_v47 }
 0x5c2   : > { %v764_v49 = vpack.c.bf16 %v763_v48, %v763_v48 }
 0x5c4   : > { %968 = vmatmul.msk.bf16.vlgmr.msrb.gmra.mxu3 %vm482_vm0, %v764_v49 }
 0x647   : > { %v797_v55 = vpop.f32.mrf.mxu3 }
 0x648   : > { %v798_v56 = vadd.f32 %v1019_v54, %v797_v55 }
 0x64a   : > { %v801_v57 = vmul.f32 %v798_v56, %v798_v56 }
 0x64c   : > { %v802_v58 = vmul.f32 %v801_v57, %v798_v56 }
 0x64e   : > { %v803_v59 = vmul.f32 0.044715, %v802_v58 }
 0x64f   : > { %v799_v60 = vpop.f32.mrf.mxu3 }
 0x650   : > { %v804_v61 = vadd.f32 %v803_v59, %v798_v56 }
 0x652   : > { %v805_v62 = vmul.f32 0.7978846, %v804_v61 }
 0x654   : > { %1035 = vtanh.f32 %v805_v62 }
 0x65a   : > { %v1036_v63 = vpop.eup %1035 }
 0x65b   : > { %v807_v0 = vadd.f32 1.0, %v1036_v63 }
 0x65d   : > { %v808_v2 = vmul.f32 0.5, %v807_v0 }
 0x65f   : > { %v809_v3 = vmul.f32 %v808_v2, %v798_v56 }
 0x661   : > { %v810_v4 = vpack.c.bf16 %v809_v3, %v809_v3 }
 0x663   : > { %985 = vmatmul.msk.bf16.vlgmr.msra.gmra.mxu2 %vm847_vm11, %v810_v4 }
 0x6e6   : > { %v860_v6 = vpop.f32.mrf.mxu2 }
 0x6e7   : > { %v861_v7 = vadd.f32 %v1020_v5, %v860_v6 }
 0x6e9   : > { %v864_v8 = vadd.f32 %v861_v7, %v1194_v26 }
 0x6eb   : > { %v865_v10 = vpack.c.bf16 %v864_v8, %v864_v8 }
 0x6ed   : > { %867 = vst.msk [vmem:[%s476_s26] sm:$0xf] %vm866_vm12, %v865_v10 }
 0x6ee   : > { %v862_v11 = vpop.f32.mrf.mxu2 }
 0x6ef PF: > { %s24_s29 = sadd.s32 1, %s1043_s29  }
 0x6f0   : > { %p21_p4 = scmp.ge.s32.totalorder %s24_s29, 4  }
 0x6f2   :  { %23 = sbr.rel (!%p21_p4) target bundleno = 1 (0x1), region = 109 }

</bundles_post_ra>
